<compile_context>
chip_gen: v7x
topology: tpu7x:2x2x1
jax: 0.10.0
libtpu: 0.0.40
codegen_flags: <defaults>
</compile_context>

<pallas_src>
import jax
import jax.numpy as jnp
from jax.experimental import pallas as pl
from jax.experimental.pallas import tpu as pltpu


def _round_up(x, m):
    return ((x + m - 1) // m) * m


# ---------------------------------------------------------------------------
# Generation-aware VMEM budget (48 MiB on v7x, ~96 MiB on v5e/v6e).
# ---------------------------------------------------------------------------
_VMEM_LIMIT = None


def _vmem_limit():
    global _VMEM_LIMIT
    if _VMEM_LIMIT is None:
        cap = None
        try:
            info = pltpu.get_tpu_info()
            cap = getattr(info, "vmem_capacity_bytes", None)
        except Exception:
            cap = None
        if not cap:
            _VMEM_LIMIT = 48 * 1024 * 1024          # conservative (v7x-safe)
        else:
            _VMEM_LIMIT = max(48 * 1024 * 1024,
                              min(100 * 1024 * 1024, int(cap) * 3 // 4))
    return _VMEM_LIMIT


# ---------------------------------------------------------------------------
# Tiled matmul + bias:  (N, K) @ (K, M) + b  ->  (N, M), f32 accumulation.
# bf16 activations/weights on the MXU; f32-out path accumulates directly into
# the resident output block (no scratch), bf16-out path uses a f32 accumulator.
# ---------------------------------------------------------------------------
def _matmul_bias_f32_kernel(x_ref, w_ref, b_ref, o_ref):
    k = pl.program_id(2)

    @pl.when(k == 0)
    def _():
        o_ref[...] = jnp.zeros_like(o_ref)

    o_ref[...] += jnp.dot(x_ref[...], w_ref[...],
                          preferred_element_type=jnp.float32)

    @pl.when(k == pl.num_programs(2) - 1)
    def _():
        o_ref[...] += b_ref[...]


def _matmul_bias_acc_kernel(x_ref, w_ref, b_ref, o_ref, acc_ref):
    k = pl.program_id(2)

    @pl.when(k == 0)
    def _():
        acc_ref[...] = jnp.zeros_like(acc_ref)

    acc_ref[...] += jnp.dot(x_ref[...], w_ref[...],
                            preferred_element_type=jnp.float32)

    @pl.when(k == pl.num_programs(2) - 1)
    def _():
        o_ref[...] = (acc_ref[...] + b_ref[...]).astype(o_ref.dtype)


def matmul_bias(x, w, b, *, out_dtype=jnp.float32, tm=256, tn=512, tk=512):
    """x:(N,K), w:(K,M), b:(M,) -> (N,M) in out_dtype. Pads/casts internally."""
    N, K = x.shape
    K2, M = w.shape
    assert K == K2, (K, K2)

    x = x.astype(jnp.bfloat16)       # cast activations once, outside the kernel
    w = w.astype(jnp.bfloat16)

    tm = min(tm, _round_up(N, 16))   # bf16 min sublane tile = 16
    tn = min(tn, _round_up(M, 128))
    tk = min(tk, _round_up(K, 128))
    Np, Kp, Mp = _round_up(N, tm), _round_up(K, tk), _round_up(M, tn)

    xp = jnp.pad(x, ((0, Np - N), (0, Kp - K))) if (Np, Kp) != (N, K) else x
    wp = jnp.pad(w, ((0, Kp - K), (0, Mp - M))) if (Kp, Mp) != (K, M) else w
    bp = (jnp.pad(b, (0, Mp - M)) if Mp != M else b)
    bp = bp.reshape(1, Mp).astype(jnp.float32)

    f32_out = jnp.dtype(out_dtype) == jnp.dtype(jnp.float32)
    kernel = _matmul_bias_f32_kernel if f32_out else _matmul_bias_acc_kernel
    scratch = [] if f32_out else [pltpu.VMEM((tm, tn), jnp.float32)]

    out = pl.pallas_call(
        kernel,
        out_shape=jax.ShapeDtypeStruct((Np, Mp), out_dtype),
        grid_spec=pltpu.PrefetchScalarGridSpec(
            num_scalar_prefetch=0,
            grid=(Np // tm, Mp // tn, Kp // tk),
            in_specs=[
                pl.BlockSpec((tm, tk), lambda i, j, k: (i, k)),
                pl.BlockSpec((tk, tn), lambda i, j, k: (k, j)),
                pl.BlockSpec((1, tn), lambda i, j, k: (0, j)),
            ],
            out_specs=pl.BlockSpec((tm, tn), lambda i, j, k: (i, j)),
            scratch_shapes=scratch,
        ),
        compiler_params=pltpu.CompilerParams(
            dimension_semantics=("parallel", "parallel", "arbitrary"),
            vmem_limit_bytes=_vmem_limit()),
    )(xp, wp, bp)
    return out[:N, :M]


# ---------------------------------------------------------------------------
# GRU recurrence kernel.  gi (= x@W_ih + b_ih) is precomputed for all steps
# (bf16); per-step body is one (BB,Hp)@(Hp,3Hp) dot + gate math (f32).
# PyTorch gate order (r, z, n):
#   r = sigmoid(gi_r + gh_r); z = sigmoid(gi_z + gh_z)
#   n = tanh(gi_n + r * gh_n); h' = (1 - z) * n + z * h
# ---------------------------------------------------------------------------
def _gru_time_block(Bp, Hp, time_block):
    """Largest TT <= time_block whose pipelined VMEM footprint fits the budget."""
    budget = (_vmem_limit() * 3) // 4
    TT = max(1, min(time_block, 8))
    while TT > 1:
        gi_bytes = 2 * TT * Bp * 3 * Hp * 2      # double-buffered bf16
        y_bytes = 2 * TT * Bp * Hp * 2           # double-buffered bf16
        whh_bytes = 2 * Hp * 3 * Hp * 2          # resident bf16 weight
        misc = Bp * 3 * Hp * 4 * 2 + Bp * Hp * 4 * 4
        if gi_bytes + y_bytes + whh_bytes + misc <= budget:
            break
        TT //= 2
    return TT


def gru_layer(gi, gic, h0, whh, bhh, *, time_block=8, batch_block=None):
    """gi:(T,Bp,3Hp) bf16, gic:(Bp,3Hp) f32, h0:(Bp,Hp) f32,
    whh:(Hp,3Hp) bf16, bhh:(1,3Hp) f32 -> (y:(T,Bp,Hp) bf16, hT:(Bp,Hp) f32)."""
    T, Bp, G3 = gi.shape
    Hp = h0.shape[-1]

    TT = _gru_time_block(Bp, Hp, time_block)
    Tp = _round_up(T, TT)                         # keep TT amortization
    if Tp != T:
        gi = jnp.pad(gi, ((0, Tp - T), (0, 0), (0, 0)))

    # Batch splitting across TensorCores (v7x) only pays off when each tile
    # keeps >=128 rows; at small batches (and on v5e/v6e) use a single tile.
    BB = batch_block if batch_block is not None else Bp

    def kernel(gi_ref, gic_ref, h0_ref, whh_ref, bhh_ref, y_ref, hT_ref, h_scr):
        t = pl.program_id(1)

        @pl.when(t == 0)
        def _():
            h_scr[...] = h0_ref[...]

        gic_v = gic_ref[...]          # (BB, 3Hp) f32, time-invariant context term
        whh_v = whh_ref[...]          # (Hp, 3Hp) bf16, constant block index
        bhh_v = bhh_ref[...]          # (1, 3Hp)  f32

        for tt in range(TT):          # static unroll, TT <= 8
            h = h_scr[...]            # reload from VMEM -> bounded live range
            gi_t = gi_ref[tt].astype(jnp.float32) + gic_v          # (BB, 3Hp)
            gh = jnp.dot(h.astype(whh_v.dtype), whh_v,
                         preferred_element_type=jnp.float32) + bhh_v
            r = jax.nn.sigmoid(gi_t[:, :Hp] + gh[:, :Hp])
            z = jax.nn.sigmoid(gi_t[:, Hp:2 * Hp] + gh[:, Hp:2 * Hp])
            n = jnp.tanh(gi_t[:, 2 * Hp:] + r * gh[:, 2 * Hp:])
            h_new = (1.0 - z) * n + z * h
            if Tp != T:               # freeze hidden state on padded timesteps
                h_new = jnp.where(t * TT + tt < T, h_new, h)
            y_ref[tt] = h_new.astype(y_ref.dtype)
            h_scr[...] = h_new        # store back -> bounded live range

        hT_ref[...] = h_scr[...].astype(hT_ref.dtype)

    y, hT = pl.pallas_call(
        kernel,
        out_shape=(jax.ShapeDtypeStruct((Tp, Bp, Hp), jnp.bfloat16),
                   jax.ShapeDtypeStruct((Bp, Hp), jnp.float32)),
        grid_spec=pltpu.PrefetchScalarGridSpec(
            num_scalar_prefetch=0,
            grid=(Bp // BB, Tp // TT),
            in_specs=[
                pl.BlockSpec((TT, BB, G3), lambda b, t: (t, b, 0)),  # gi steps (bf16)
                pl.BlockSpec((BB, G3), lambda b, t: (b, 0)),         # context gi (f32)
                pl.BlockSpec((BB, Hp), lambda b, t: (b, 0)),         # h0
                pl.BlockSpec((Hp, G3), lambda b, t: (0, 0)),         # W_hh (const idx)
                pl.BlockSpec((1, G3), lambda b, t: (0, 0)),          # b_hh
            ],
            out_specs=[
                pl.BlockSpec((TT, BB, Hp), lambda b, t: (t, b, 0)),  # y steps (bf16)
                pl.BlockSpec((BB, Hp), lambda b, t: (b, 0)),         # final hidden
            ],
            scratch_shapes=[pltpu.VMEM((BB, Hp), jnp.float32)],
        ),
        compiler_params=pltpu.CompilerParams(
            dimension_semantics=("parallel", "arbitrary"),
            vmem_limit_bytes=_vmem_limit()),
    )(gi, gic, h0, whh, bhh)
    return y[:T], hT


# ---------------------------------------------------------------------------
# Parameter construction (PyTorch-equivalent shapes, gate-padded to Hp).
# ---------------------------------------------------------------------------
def _pad_gate_cols(w, H, Hp):
    """(..., 3*H) -> (..., 3*Hp): each gate block zero-padded to Hp columns."""
    if Hp == H:
        return w
    lead = [(0, 0)] * (w.ndim - 1)
    parts = [jnp.pad(w[..., g * H:(g + 1) * H], lead + [(0, Hp - H)])
             for g in range(3)]
    return jnp.concatenate(parts, axis=-1)


def make_gru_params(key, num_layers, input_size, hidden, Hp):
    scale = 1.0 / (hidden ** 0.5)
    layers = []
    for l in range(num_layers):
        in_sz = input_size if l == 0 else hidden
        k = jax.random.fold_in(key, l)
        k1, k2, k3, k4 = jax.random.split(k, 4)
        wih = jax.random.uniform(k1, (in_sz, 3 * hidden), jnp.float32, -scale, scale)
        whh = jax.random.uniform(k2, (hidden, 3 * hidden), jnp.float32, -scale, scale)
        bih = jax.random.uniform(k3, (3 * hidden,), jnp.float32, -scale, scale)
        bhh = jax.random.uniform(k4, (3 * hidden,), jnp.float32, -scale, scale)

        wih = _pad_gate_cols(wih, hidden, Hp)                 # (in_sz, 3Hp)
        whh = _pad_gate_cols(whh, hidden, Hp)
        whh = jnp.pad(whh, ((0, Hp - hidden), (0, 0)))        # (Hp, 3Hp)
        bih = _pad_gate_cols(bih, hidden, Hp)                 # (3Hp,)
        bhh = _pad_gate_cols(bhh, hidden, Hp)
        if l > 0:  # deeper layers consume the padded hidden vector
            wih = jnp.pad(wih, ((0, Hp - hidden), (0, 0)))

        layers.append(dict(
            wih=wih.astype(jnp.bfloat16),
            whh=whh.astype(jnp.bfloat16),
            bih=bih,
            bhh=bhh.reshape(1, 3 * Hp),
        ))
    return layers


def run_gru_stack(layers, gi0, gic0, h0_stack):
    """gi0:(T,Bp,3Hp) bf16, gic0:(Bp,3Hp) f32, h0_stack:(L,Bp,Hp) f32."""
    T, Bp, G3 = gi0.shape
    Hp = h0_stack.shape[-1]
    zeros_gic = jnp.zeros((Bp, G3), jnp.float32)
    gi, gic = gi0, gic0
    finals = []
    y = None
    for l, p in enumerate(layers):
        if l > 0:
            gi = matmul_bias(y.reshape(T * Bp, Hp), p['wih'], p['bih'],
                             out_dtype=jnp.bfloat16).reshape(T, Bp, G3)
            gic = zeros_gic
        y, hT = gru_layer(gi, gic, h0_stack[l], p['whh'], p['bhh'])
        finals.append(hT)
        # TODO(synk): inter-layer dropout omitted (eval-mode semantics).
    return y, jnp.stack(finals, axis=0)


# ---------------------------------------------------------------------------
# Encoder / Decoder (forward only)
# ---------------------------------------------------------------------------
class Seq2SeqEncoder:
    def __init__(self, key, vocab_size, embed_size, num_hiddens, num_layers,
                 dropout=0.0):
        k1, k2 = jax.random.split(key)
        self.E, self.H, self.L, self.V = embed_size, num_hiddens, num_layers, vocab_size
        self.Hp = _round_up(num_hiddens, 128)
        self.Ep = _round_up(embed_size, 128)
        emb = jax.random.normal(k1, (vocab_size, embed_size), jnp.float32) * 0.1
        self.embedding = jnp.pad(emb, ((0, 0), (0, self.Ep - embed_size)))  # (V, Ep)
        self.gru = make_gru_params(k2, num_layers, embed_size, num_hiddens, self.Hp)
        # pre-pad layer-0 W_ih contraction rows to Ep (so call-time pads are no-ops)
        self.gru[0]['wih'] = jnp.pad(self.gru[0]['wih'],
                                     ((0, self.Ep - embed_size), (0, 0)))

    def __call__(self, X_tokens):
        B, T = X_tokens.shape
        Bp, Hp = _round_up(B, 16), self.Hp
        tok = jnp.zeros((Bp, T), jnp.int32).at[:B, :].set(X_tokens)
        emb = jnp.take(self.embedding, tok, axis=0)        # (Bp,T,Ep) gather glue
        x = jnp.transpose(emb, (1, 0, 2))                  # (T,Bp,Ep)
        l0 = self.gru[0]
        # hoisted input projection over all timesteps (one big matmul, bf16 out)
        gi0 = matmul_bias(x.reshape(T * Bp, self.Ep), l0['wih'], l0['bih'],
                          out_dtype=jnp.bfloat16).reshape(T, Bp, 3 * Hp)
        gic0 = jnp.zeros((Bp, 3 * Hp), jnp.float32)
        h0 = jnp.zeros((self.L, Bp, Hp), jnp.float32)
        y, state = run_gru_stack(self.gru, gi0, gic0, h0)
        return (y[:, :B, :self.H].astype(jnp.float32),
                state[:, :B, :self.H])


class Seq2SeqDecoder:
    def __init__(self, key, vocab_size, embed_size, num_hiddens, num_layers,
                 dropout=0.0):
        k1, k2, k3, k4 = jax.random.split(key, 4)
        self.E, self.H, self.L, self.V = embed_size, num_hiddens, num_layers, vocab_size
        self.Hp = _round_up(num_hiddens, 128)
        self.Ep = _round_up(embed_size, 128)
        self.Vp = _round_up(vocab_size, 128)
        emb = jax.random.normal(k1, (vocab_size, embed_size), jnp.float32) * 0.1
        self.embedding = jnp.pad(emb, ((0, 0), (0, self.Ep - embed_size)))  # (V, Ep)
        self.gru = make_gru_params(k2, num_layers, embed_size + num_hiddens,
                                   num_hiddens, self.Hp)
        # Split layer-0 W_ih into the embedding part (rows padded to Ep) and the
        # time-invariant context part (rows padded to Hp): the context is never
        # broadcast / concatenated over T.
        wih0 = self.gru[0]['wih']                              # (E+H, 3Hp) bf16
        self.wih0_x = jnp.pad(wih0[:embed_size],
                              ((0, self.Ep - embed_size), (0, 0)))   # (Ep, 3Hp)
        self.wih0_c = jnp.pad(wih0[embed_size:],
                              ((0, self.Hp - num_hiddens), (0, 0)))  # (Hp, 3Hp)
        self.zero_bias3h = jnp.zeros((3 * self.Hp,), jnp.float32)
        scale = 1.0 / (num_hiddens ** 0.5)
        w = jax.random.uniform(k3, (num_hiddens, vocab_size), jnp.float32,
                               -scale, scale)
        b = jax.random.uniform(k4, (vocab_size,), jnp.float32, -scale, scale)
        # lane-dense dense projection (Hp, Vp), pre-padded at init
        self.dense_w = jnp.pad(w, ((0, self.Hp - num_hiddens),
                                   (0, self.Vp - vocab_size))).astype(jnp.bfloat16)
        self.dense_b = jnp.pad(b, (0, self.Vp - vocab_size))

    def init_state(self, enc_outputs, *args):
        return enc_outputs[1]

    def __call__(self, X_tokens, state):
        B, T = X_tokens.shape
        Bp, Hp, H = _round_up(B, 16), self.Hp, self.H
        tok = jnp.zeros((Bp, T), jnp.int32).at[:B, :].set(X_tokens)
        emb = jnp.take(self.embedding, tok, axis=0)        # (Bp,T,Ep)
        x = jnp.transpose(emb, (1, 0, 2))                  # (T,Bp,Ep)

        state_p = jnp.zeros((self.L, Bp, Hp), jnp.float32).at[:, :B, :H].set(state)

        # layer-0 input projection: one big matmul over all timesteps ...
        gi0 = matmul_bias(x.reshape(T * Bp, self.Ep), self.wih0_x,
                          self.gru[0]['bih'], out_dtype=jnp.bfloat16
                          ).reshape(T, Bp, 3 * Hp)
        # ... plus a single (Bp, 3Hp) term from the time-invariant context.
        context = state_p[-1]                              # (Bp, Hp)
        gic0 = matmul_bias(context, self.wih0_c, self.zero_bias3h)   # f32

        y, new_state_p = run_gru_stack(self.gru, gi0, gic0, state_p)

        # Transpose the small hidden tensor (T,Bp,Hp)->(Bp,T,Hp) BEFORE the
        # vocab projection so logits come out already in (B,T,V) order.
        y_bt = jnp.transpose(y, (1, 0, 2)).reshape(Bp * T, Hp)
        logits = matmul_bias(y_bt, self.dense_w, self.dense_b
                             ).reshape(Bp, T, self.Vp)
        output = logits[:B, :, :self.V]                    # (B,T,V)
        new_state = new_state_p[:, :B, :H]
        return output, new_state


# ---------------------------------------------------------------------------
if __name__ == "__main__":
    key = jax.random.PRNGKey(0)
    k_enc, k_dec, k_src, k_tgt = jax.random.split(key, 4)

    vocab_size = 24      # src and tgt vocab
    embed_size = 16
    num_hiddens = 32
    num_layers = 2
    batch = 2
    seq_len = 8

    encoder = Seq2SeqEncoder(k_enc, vocab_size, embed_size, num_hiddens, num_layers)
    decoder = Seq2SeqDecoder(k_dec, vocab_size, embed_size, num_hiddens, num_layers)

    # jit the whole forward: fuses token-pad / gather / reshape glue and
    # constant-folds any remaining weight padding.
    enc_fn = jax.jit(lambda tok: encoder(tok))
    dec_fn = jax.jit(lambda tok, st: decoder(tok, st))

    X_src = jax.random.randint(k_src, (batch, seq_len), 0, vocab_size, jnp.int32)
    X_tgt = jax.random.randint(k_tgt, (batch, seq_len), 0, vocab_size, jnp.int32)

    enc_outputs = enc_fn(X_src)
    state = decoder.init_state(enc_outputs, None)

    output, new_state = dec_fn(X_tgt, state)
    output = jax.block_until_ready(output)
    new_state = jax.block_until_ready(new_state)

    assert output.shape == (batch, seq_len, vocab_size), output.shape
    assert new_state.shape == (num_layers, batch, num_hiddens), new_state.shape
    assert jnp.all(jnp.isfinite(output))

    print("KERNEL_OK")
</pallas_src>

<mosaic_0001>
module attributes {stable_mosaic.version = 11 : i64} {
  func.func @_matmul_bias_acc_kernel(%arg0: i32, %arg1: i32, %arg2: i32, %arg3: memref<128x128xbf16, #tpu.memory_space<vmem>>, %arg4: memref<128x384xbf16, #tpu.memory_space<vmem>>, %arg5: memref<1x384xf32, #tpu.memory_space<vmem>>, %arg6: memref<128x384xbf16, #tpu.memory_space<vmem>>, %arg7: memref<128x384xf32, #tpu.memory_space<vmem>>) attributes {dimension_semantics = [#tpu.dimension_semantics<parallel>, #tpu.dimension_semantics<parallel>, #tpu.dimension_semantics<arbitrary>], iteration_bounds = array<i64: 1, 1, 1>, scalar_prefetch = 0 : i64, scratch_operands = 1 : i64, tpu.core_type = #tpu.core_type<tc>, window_params = [{transform_indices = @transform_0, window_bounds = array<i64: 128, 128>}, {transform_indices = @transform_1, window_bounds = array<i64: 128, 384>}, {transform_indices = @transform_2, window_bounds = array<i64: 1, 384>}, {transform_indices = @transform_3, window_bounds = array<i64: 128, 384>}]} {
    %c0_i32 = arith.constant 0 : i32
    %0 = arith.cmpi eq, %arg2, %c0_i32 : i32
    %1 = arith.extui %0 : i1 to i32
    %c0_i32_0 = arith.constant 0 : i32
    %2 = arith.cmpi ne, %1, %c0_i32_0 : i32
    scf.if %2 {
      %cst_10 = arith.constant 0.000000e+00 : f32
      %12 = vector.broadcast %cst_10 : f32 to vector<128x384xf32>
      %c0_11 = arith.constant 0 : index
      %c0_12 = arith.constant 0 : index
      %13 = vector.load %arg7[%c0_11, %c0_12] : memref<128x384xf32, #tpu.memory_space<vmem>>, vector<128x384xf32>
      tpu.vector_store %arg7[%c0_11, %c0_12], %12 {strides = array<i32>} : memref<128x384xf32, #tpu.memory_space<vmem>>, vector<128x384xf32>,
    } else {
    }
    %c0 = arith.constant 0 : index
    %c0_1 = arith.constant 0 : index
    %3 = vector.load %arg7[%c0, %c0_1] : memref<128x384xf32, #tpu.memory_space<vmem>>, vector<128x384xf32>
    %c0_2 = arith.constant 0 : index
    %c0_3 = arith.constant 0 : index
    %4 = vector.load %arg3[%c0_2, %c0_3] : memref<128x128xbf16, #tpu.memory_space<vmem>>, vector<128x128xbf16>
    %c0_4 = arith.constant 0 : index
    %c0_5 = arith.constant 0 : index
    %5 = vector.load %arg4[%c0_4, %c0_5] : memref<128x384xbf16, #tpu.memory_space<vmem>>, vector<128x384xbf16>
    %cst = arith.constant dense<0.000000e+00> : vector<128x384xf32>
    %6 = tpu.matmul %4, %5, %cst {dimension_numbers = #tpu.dot_dimension_numbers<[1], [0], [0], [1], [0, 0, 1, 1], [], []>} : vector<128x128xbf16>, vector<128x384xbf16>, vector<128x384xf32> -> vector<128x384xf32>
    %7 = arith.addf %3, %6 : vector<128x384xf32>
    %c0_6 = arith.constant 0 : index
    %c0_7 = arith.constant 0 : index
    %8 = vector.load %arg7[%c0_6, %c0_7] : memref<128x384xf32, #tpu.memory_space<vmem>>, vector<128x384xf32>
    tpu.vector_store %arg7[%c0_6, %c0_7], %7 {strides = array<i32>} : memref<128x384xf32, #tpu.memory_space<vmem>>, vector<128x384xf32>,
    %c0_i32_8 = arith.constant 0 : i32
    %9 = arith.cmpi eq, %arg2, %c0_i32_8 : i32
    %10 = arith.extui %9 : i1 to i32
    %c0_i32_9 = arith.constant 0 : i32
    %11 = arith.cmpi ne, %10, %c0_i32_9 : i32
    scf.if %11 {
      %c0_10 = arith.constant 0 : index
      %c0_11 = arith.constant 0 : index
      %12 = vector.load %arg7[%c0_10, %c0_11] : memref<128x384xf32, #tpu.memory_space<vmem>>, vector<128x384xf32>
      %c0_12 = arith.constant 0 : index
      %c0_13 = arith.constant 0 : index
      %13 = vector.load %arg5[%c0_12, %c0_13] : memref<1x384xf32, #tpu.memory_space<vmem>>, vector<1x384xf32>
      %14 = vector.broadcast %13 : vector<1x384xf32> to vector<128x384xf32>
      %15 = arith.addf %12, %14 : vector<128x384xf32>
      %16 = arith.truncf %15 : vector<128x384xf32> to vector<128x384xbf16>
      %c0_14 = arith.constant 0 : index
      %c0_15 = arith.constant 0 : index
      %17 = vector.load %arg6[%c0_14, %c0_15] : memref<128x384xbf16, #tpu.memory_space<vmem>>, vector<128x384xbf16>
      tpu.vector_store %arg6[%c0_14, %c0_15], %16 {strides = array<i32>} : memref<128x384xbf16, #tpu.memory_space<vmem>>, vector<128x384xbf16>,
    } else {
    }
    return
  }
  func.func @transform_0(%arg0: i32, %arg1: i32, %arg2: i32) -> (i32, i32) {
    %c0_i32 = arith.constant 0 : i32
    return %arg0, %arg2 : i32, i32
  }
  func.func @transform_1(%arg0: i32, %arg1: i32, %arg2: i32) -> (i32, i32) {
    %c0_i32 = arith.constant 0 : i32
    return %arg2, %arg1 : i32, i32
  }
  func.func @transform_2(%arg0: i32, %arg1: i32, %arg2: i32) -> (i32, i32) {
    %c0_i32 = arith.constant 0 : i32
    %c0_i32_0 = arith.constant 0 : i32
    return %c0_i32, %arg1 : i32, i32
  }
  func.func @transform_3(%arg0: i32, %arg1: i32, %arg2: i32) -> (i32, i32) {
    %c0_i32 = arith.constant 0 : i32
    return %arg0, %arg1 : i32, i32
  }
}

module attributes {stable_mosaic.version = 11 : i64} {
  func.func @kernel(%arg0: i32, %arg1: i32, %arg2: memref<8x16x384xbf16, #tpu.memory_space<vmem>>, %arg3: memref<16x384xf32, #tpu.memory_space<vmem>>, %arg4: memref<16x128xf32, #tpu.memory_space<vmem>>, %arg5: memref<128x384xbf16, #tpu.memory_space<vmem>>, %arg6: memref<1x384xf32, #tpu.memory_space<vmem>>, %arg7: memref<8x16x128xbf16, #tpu.memory_space<vmem>>, %arg8: memref<16x128xf32, #tpu.memory_space<vmem>>, %arg9: memref<16x128xf32, #tpu.memory_space<vmem>>) attributes {dimension_semantics = [#tpu.dimension_semantics<parallel>, #tpu.dimension_semantics<arbitrary>], iteration_bounds = array<i64: 1, 1>, scalar_prefetch = 0 : i64, scratch_operands = 1 : i64, tpu.core_type = #tpu.core_type<tc>, window_params = [{transform_indices = @transform_0, window_bounds = array<i64: 8, 16, 384>}, {transform_indices = @transform_1, window_bounds = array<i64: 16, 384>}, {transform_indices = @transform_2, window_bounds = array<i64: 16, 128>}, {pipeline_mode = #tpu.pipeline_mode<synchronous>, transform_indices = @transform_3, window_bounds = array<i64: 128, 384>}, {pipeline_mode = #tpu.pipeline_mode<synchronous>, transform_indices = @transform_4, window_bounds = array<i64: 1, 384>}, {transform_indices = @transform_5, window_bounds = array<i64: 8, 16, 128>}, {transform_indices = @transform_6, window_bounds = array<i64: 16, 128>}]} {
    %c0_i32 = arith.constant 0 : i32
    %0 = arith.cmpi eq, %arg1, %c0_i32 : i32
    %1 = arith.extui %0 : i1 to i32
    %c0_i32_0 = arith.constant 0 : i32
    %2 = arith.cmpi ne, %1, %c0_i32_0 : i32
    scf.if %2 {
      %c0_114 = arith.constant 0 : index
      %c0_115 = arith.constant 0 : index
      %328 = vector.load %arg4[%c0_114, %c0_115] : memref<16x128xf32, #tpu.memory_space<vmem>>, vector<16x128xf32>
      %c0_116 = arith.constant 0 : index
      %c0_117 = arith.constant 0 : index
      %329 = vector.load %arg9[%c0_116, %c0_117] : memref<16x128xf32, #tpu.memory_space<vmem>>, vector<16x128xf32>
      tpu.vector_store %arg9[%c0_116, %c0_117], %328 {strides = array<i32>} : memref<16x128xf32, #tpu.memory_space<vmem>>, vector<16x128xf32>,
    } else {
    }
    %c0 = arith.constant 0 : index
    %c0_1 = arith.constant 0 : index
    %3 = vector.load %arg3[%c0, %c0_1] : memref<16x384xf32, #tpu.memory_space<vmem>>, vector<16x384xf32>
    %c0_2 = arith.constant 0 : index
    %c0_3 = arith.constant 0 : index
    %4 = vector.load %arg5[%c0_2, %c0_3] : memref<128x384xbf16, #tpu.memory_space<vmem>>, vector<128x384xbf16>
    %c0_4 = arith.constant 0 : index
    %c0_5 = arith.constant 0 : index
    %5 = vector.load %arg6[%c0_4, %c0_5] : memref<1x384xf32, #tpu.memory_space<vmem>>, vector<1x384xf32>
    %c0_6 = arith.constant 0 : index
    %c0_7 = arith.constant 0 : index
    %6 = vector.load %arg9[%c0_6, %c0_7] : memref<16x128xf32, #tpu.memory_space<vmem>>, vector<16x128xf32>
    %c0_8 = arith.constant 0 : index
    %c0_9 = arith.constant 0 : index
    %c0_10 = arith.constant 0 : index
    %7 = vector.load %arg2[%c0_8, %c0_9, %c0_10] : memref<8x16x384xbf16, #tpu.memory_space<vmem>>, vector<1x16x384xbf16>
    %8 = vector.shape_cast %7 : vector<1x16x384xbf16> to vector<16x384xbf16>
    %9 = arith.extf %8 : vector<16x384xbf16> to vector<16x384xf32>
    %10 = arith.addf %9, %3 : vector<16x384xf32>
    %11 = arith.truncf %6 : vector<16x128xf32> to vector<16x128xbf16>
    %cst = arith.constant dense<0.000000e+00> : vector<16x384xf32>
    %12 = tpu.matmul %11, %4, %cst {dimension_numbers = #tpu.dot_dimension_numbers<[1], [0], [0], [1], [0, 0, 1, 1], [], []>} : vector<16x128xbf16>, vector<128x384xbf16>, vector<16x384xf32> -> vector<16x384xf32>
    %13 = vector.broadcast %5 : vector<1x384xf32> to vector<16x384xf32>
    %14 = arith.addf %12, %13 : vector<16x384xf32>
    %15 = vector.extract_strided_slice %10 {offsets = [0, 0], sizes = [16, 128], strides = [1, 1]} : vector<16x384xf32> to vector<16x128xf32>
    %16 = vector.extract_strided_slice %14 {offsets = [0, 0], sizes = [16, 128], strides = [1, 1]} : vector<16x384xf32> to vector<16x128xf32>
    %17 = arith.addf %15, %16 : vector<16x128xf32>
    %18 = arith.negf %17 : vector<16x128xf32>
    %19 = math.exp %18 : vector<16x128xf32>
    %cst_11 = arith.constant 1.000000e+00 : f32
    %20 = vector.broadcast %cst_11 : f32 to vector<16x128xf32>
    %21 = arith.addf %20, %19 : vector<16x128xf32>
    %22 = arith.divf %20, %21 : vector<16x128xf32>
    %23 = vector.extract_strided_slice %10 {offsets = [0, 128], sizes = [16, 128], strides = [1, 1]} : vector<16x384xf32> to vector<16x128xf32>
    %24 = vector.extract_strided_slice %14 {offsets = [0, 128], sizes = [16, 128], strides = [1, 1]} : vector<16x384xf32> to vector<16x128xf32>
    %25 = arith.addf %23, %24 : vector<16x128xf32>
    %26 = arith.negf %25 : vector<16x128xf32>
    %27 = math.exp %26 : vector<16x128xf32>
    %cst_12 = arith.constant 1.000000e+00 : f32
    %28 = vector.broadcast %cst_12 : f32 to vector<16x128xf32>
    %29 = arith.addf %28, %27 : vector<16x128xf32>
    %30 = arith.divf %28, %29 : vector<16x128xf32>
    %31 = vector.extract_strided_slice %10 {offsets = [0, 256], sizes = [16, 128], strides = [1, 1]} : vector<16x384xf32> to vector<16x128xf32>
    %32 = vector.extract_strided_slice %14 {offsets = [0, 256], sizes = [16, 128], strides = [1, 1]} : vector<16x384xf32> to vector<16x128xf32>
    %33 = arith.mulf %22, %32 : vector<16x128xf32>
    %34 = arith.addf %31, %33 : vector<16x128xf32>
    %35 = math.tanh %34 : vector<16x128xf32>
    %cst_13 = arith.constant 1.000000e+00 : f32
    %36 = vector.broadcast %cst_13 : f32 to vector<16x128xf32>
    %37 = arith.subf %36, %30 : vector<16x128xf32>
    %38 = arith.mulf %37, %35 : vector<16x128xf32>
    %39 = arith.mulf %30, %6 : vector<16x128xf32>
    %40 = arith.addf %38, %39 : vector<16x128xf32>
    %41 = arith.truncf %40 : vector<16x128xf32> to vector<16x128xbf16>
    %c0_14 = arith.constant 0 : index
    %c0_15 = arith.constant 0 : index
    %c0_16 = arith.constant 0 : index
    %42 = vector.load %arg7[%c0_14, %c0_15, %c0_16] : memref<8x16x128xbf16, #tpu.memory_space<vmem>>, vector<1x16x128xbf16>
    %43 = vector.shape_cast %42 : vector<1x16x128xbf16> to vector<16x128xbf16>
    %44 = vector.shape_cast %41 : vector<16x128xbf16> to vector<1x16x128xbf16>
    tpu.vector_store %arg7[%c0_14, %c0_15, %c0_16], %44 {strides = array<i32>} : memref<8x16x128xbf16, #tpu.memory_space<vmem>>, vector<1x16x128xbf16>,
    %c0_17 = arith.constant 0 : index
    %c0_18 = arith.constant 0 : index
    %45 = vector.load %arg9[%c0_17, %c0_18] : memref<16x128xf32, #tpu.memory_space<vmem>>, vector<16x128xf32>
    tpu.vector_store %arg9[%c0_17, %c0_18], %40 {strides = array<i32>} : memref<16x128xf32, #tpu.memory_space<vmem>>, vector<16x128xf32>,
    %c0_19 = arith.constant 0 : index
    %c0_20 = arith.constant 0 : index
    %46 = vector.load %arg9[%c0_19, %c0_20] : memref<16x128xf32, #tpu.memory_space<vmem>>, vector<16x128xf32>
    %c1 = arith.constant 1 : index
    %c0_21 = arith.constant 0 : index
    %c0_22 = arith.constant 0 : index
    %47 = vector.load %arg2[%c1, %c0_21, %c0_22] : memref<8x16x384xbf16, #tpu.memory_space<vmem>>, vector<1x16x384xbf16>
    %48 = vector.shape_cast %47 : vector<1x16x384xbf16> to vector<16x384xbf16>
    %49 = arith.extf %48 : vector<16x384xbf16> to vector<16x384xf32>
    %50 = arith.addf %49, %3 : vector<16x384xf32>
    %51 = arith.truncf %46 : vector<16x128xf32> to vector<16x128xbf16>
    %cst_23 = arith.constant dense<0.000000e+00> : vector<16x384xf32>
    %52 = tpu.matmul %51, %4, %cst_23 {dimension_numbers = #tpu.dot_dimension_numbers<[1], [0], [0], [1], [0, 0, 1, 1], [], []>} : vector<16x128xbf16>, vector<128x384xbf16>, vector<16x384xf32> -> vector<16x384xf32>
    %53 = vector.broadcast %5 : vector<1x384xf32> to vector<16x384xf32>
    %54 = arith.addf %52, %53 : vector<16x384xf32>
    %55 = vector.extract_strided_slice %50 {offsets = [0, 0], sizes = [16, 128], strides = [1, 1]} : vector<16x384xf32> to vector<16x128xf32>
    %56 = vector.extract_strided_slice %54 {offsets = [0, 0], sizes = [16, 128], strides = [1, 1]} : vector<16x384xf32> to vector<16x128xf32>
    %57 = arith.addf %55, %56 : vector<16x128xf32>
    %58 = arith.negf %57 : vector<16x128xf32>
    %59 = math.exp %58 : vector<16x128xf32>
    %cst_24 = arith.constant 1.000000e+00 : f32
    %60 = vector.broadcast %cst_24 : f32 to vector<16x128xf32>
    %61 = arith.addf %60, %59 : vector<16x128xf32>
    %62 = arith.divf %60, %61 : vector<16x128xf32>
    %63 = vector.extract_strided_slice %50 {offsets = [0, 128], sizes = [16, 128], strides = [1, 1]} : vector<16x384xf32> to vector<16x128xf32>
    %64 = vector.extract_strided_slice %54 {offsets = [0, 128], sizes = [16, 128], strides = [1, 1]} : vector<16x384xf32> to vector<16x128xf32>
    %65 = arith.addf %63, %64 : vector<16x128xf32>
    %66 = arith.negf %65 : vector<16x128xf32>
    %67 = math.exp %66 : vector<16x128xf32>
    %cst_25 = arith.constant 1.000000e+00 : f32
    %68 = vector.broadcast %cst_25 : f32 to vector<16x128xf32>
    %69 = arith.addf %68, %67 : vector<16x128xf32>
    %70 = arith.divf %68, %69 : vector<16x128xf32>
    %71 = vector.extract_strided_slice %50 {offsets = [0, 256], sizes = [16, 128], strides = [1, 1]} : vector<16x384xf32> to vector<16x128xf32>
    %72 = vector.extract_strided_slice %54 {offsets = [0, 256], sizes = [16, 128], strides = [1, 1]} : vector<16x384xf32> to vector<16x128xf32>
    %73 = arith.mulf %62, %72 : vector<16x128xf32>
    %74 = arith.addf %71, %73 : vector<16x128xf32>
    %75 = math.tanh %74 : vector<16x128xf32>
    %cst_26 = arith.constant 1.000000e+00 : f32
    %76 = vector.broadcast %cst_26 : f32 to vector<16x128xf32>
    %77 = arith.subf %76, %70 : vector<16x128xf32>
    %78 = arith.mulf %77, %75 : vector<16x128xf32>
    %79 = arith.mulf %70, %46 : vector<16x128xf32>
    %80 = arith.addf %78, %79 : vector<16x128xf32>
    %81 = arith.truncf %80 : vector<16x128xf32> to vector<16x128xbf16>
    %c1_27 = arith.constant 1 : index
    %c0_28 = arith.constant 0 : index
    %c0_29 = arith.constant 0 : index
    %82 = vector.load %arg7[%c1_27, %c0_28, %c0_29] : memref<8x16x128xbf16, #tpu.memory_space<vmem>>, vector<1x16x128xbf16>
    %83 = vector.shape_cast %82 : vector<1x16x128xbf16> to vector<16x128xbf16>
    %84 = vector.shape_cast %81 : vector<16x128xbf16> to vector<1x16x128xbf16>
    tpu.vector_store %arg7[%c1_27, %c0_28, %c0_29], %84 {strides = array<i32>} : memref<8x16x128xbf16, #tpu.memory_space<vmem>>, vector<1x16x128xbf16>,
    %c0_30 = arith.constant 0 : index
    %c0_31 = arith.constant 0 : index
    %85 = vector.load %arg9[%c0_30, %c0_31] : memref<16x128xf32, #tpu.memory_space<vmem>>, vector<16x128xf32>
    tpu.vector_store %arg9[%c0_30, %c0_31], %80 {strides = array<i32>} : memref<16x128xf32, #tpu.memory_space<vmem>>, vector<16x128xf32>,
    %c0_32 = arith.constant 0 : index
    %c0_33 = arith.constant 0 : index
    %86 = vector.load %arg9[%c0_32, %c0_33] : memref<16x128xf32, #tpu.memory_space<vmem>>, vector<16x128xf32>
    %c2 = arith.constant 2 : index
    %c0_34 = arith.constant 0 : index
    %c0_35 = arith.constant 0 : index
    %87 = vector.load %arg2[%c2, %c0_34, %c0_35] : memref<8x16x384xbf16, #tpu.memory_space<vmem>>, vector<1x16x384xbf16>
    %88 = vector.shape_cast %87 : vector<1x16x384xbf16> to vector<16x384xbf16>
    %89 = arith.extf %88 : vector<16x384xbf16> to vector<16x384xf32>
    %90 = arith.addf %89, %3 : vector<16x384xf32>
    %91 = arith.truncf %86 : vector<16x128xf32> to vector<16x128xbf16>
    %cst_36 = arith.constant dense<0.000000e+00> : vector<16x384xf32>
    %92 = tpu.matmul %91, %4, %cst_36 {dimension_numbers = #tpu.dot_dimension_numbers<[1], [0], [0], [1], [0, 0, 1, 1], [], []>} : vector<16x128xbf16>, vector<128x384xbf16>, vector<16x384xf32> -> vector<16x384xf32>
    %93 = vector.broadcast %5 : vector<1x384xf32> to vector<16x384xf32>
    %94 = arith.addf %92, %93 : vector<16x384xf32>
    %95 = vector.extract_strided_slice %90 {offsets = [0, 0], sizes = [16, 128], strides = [1, 1]} : vector<16x384xf32> to vector<16x128xf32>
    %96 = vector.extract_strided_slice %94 {offsets = [0, 0], sizes = [16, 128], strides = [1, 1]} : vector<16x384xf32> to vector<16x128xf32>
    %97 = arith.addf %95, %96 : vector<16x128xf32>
    %98 = arith.negf %97 : vector<16x128xf32>
    %99 = math.exp %98 : vector<16x128xf32>
    %cst_37 = arith.constant 1.000000e+00 : f32
    %100 = vector.broadcast %cst_37 : f32 to vector<16x128xf32>
    %101 = arith.addf %100, %99 : vector<16x128xf32>
    %102 = arith.divf %100, %101 : vector<16x128xf32>
    %103 = vector.extract_strided_slice %90 {offsets = [0, 128], sizes = [16, 128], strides = [1, 1]} : vector<16x384xf32> to vector<16x128xf32>
    %104 = vector.extract_strided_slice %94 {offsets = [0, 128], sizes = [16, 128], strides = [1, 1]} : vector<16x384xf32> to vector<16x128xf32>
    %105 = arith.addf %103, %104 : vector<16x128xf32>
    %106 = arith.negf %105 : vector<16x128xf32>
    %107 = math.exp %106 : vector<16x128xf32>
    %cst_38 = arith.constant 1.000000e+00 : f32
    %108 = vector.broadcast %cst_38 : f32 to vector<16x128xf32>
    %109 = arith.addf %108, %107 : vector<16x128xf32>
    %110 = arith.divf %108, %109 : vector<16x128xf32>
    %111 = vector.extract_strided_slice %90 {offsets = [0, 256], sizes = [16, 128], strides = [1, 1]} : vector<16x384xf32> to vector<16x128xf32>
    %112 = vector.extract_strided_slice %94 {offsets = [0, 256], sizes = [16, 128], strides = [1, 1]} : vector<16x384xf32> to vector<16x128xf32>
    %113 = arith.mulf %102, %112 : vector<16x128xf32>
    %114 = arith.addf %111, %113 : vector<16x128xf32>
    %115 = math.tanh %114 : vector<16x128xf32>
    %cst_39 = arith.constant 1.000000e+00 : f32
    %116 = vector.broadcast %cst_39 : f32 to vector<16x128xf32>
    %117 = arith.subf %116, %110 : vector<16x128xf32>
    %118 = arith.mulf %117, %115 : vector<16x128xf32>
    %119 = arith.mulf %110, %86 : vector<16x128xf32>
    %120 = arith.addf %118, %119 : vector<16x128xf32>
    %121 = arith.truncf %120 : vector<16x128xf32> to vector<16x128xbf16>
    %c2_40 = arith.constant 2 : index
    %c0_41 = arith.constant 0 : index
    %c0_42 = arith.constant 0 : index
    %122 = vector.load %arg7[%c2_40, %c0_41, %c0_42] : memref<8x16x128xbf16, #tpu.memory_space<vmem>>, vector<1x16x128xbf16>
    %123 = vector.shape_cast %122 : vector<1x16x128xbf16> to vector<16x128xbf16>
    %124 = vector.shape_cast %121 : vector<16x128xbf16> to vector<1x16x128xbf16>
    tpu.vector_store %arg7[%c2_40, %c0_41, %c0_42], %124 {strides = array<i32>} : memref<8x16x128xbf16, #tpu.memory_space<vmem>>, vector<1x16x128xbf16>,
    %c0_43 = arith.constant 0 : index
    %c0_44 = arith.constant 0 : index
    %125 = vector.load %arg9[%c0_43, %c0_44] : memref<16x128xf32, #tpu.memory_space<vmem>>, vector<16x128xf32>
    tpu.vector_store %arg9[%c0_43, %c0_44], %120 {strides = array<i32>} : memref<16x128xf32, #tpu.memory_space<vmem>>, vector<16x128xf32>,
    %c0_45 = arith.constant 0 : index
    %c0_46 = arith.constant 0 : index
    %126 = vector.load %arg9[%c0_45, %c0_46] : memref<16x128xf32, #tpu.memory_space<vmem>>, vector<16x128xf32>
    %c3 = arith.constant 3 : index
    %c0_47 = arith.constant 0 : index
    %c0_48 = arith.constant 0 : index
    %127 = vector.load %arg2[%c3, %c0_47, %c0_48] : memref<8x16x384xbf16, #tpu.memory_space<vmem>>, vector<1x16x384xbf16>
    %128 = vector.shape_cast %127 : vector<1x16x384xbf16> to vector<16x384xbf16>
    %129 = arith.extf %128 : vector<16x384xbf16> to vector<16x384xf32>
    %130 = arith.addf %129, %3 : vector<16x384xf32>
    %131 = arith.truncf %126 : vector<16x128xf32> to vector<16x128xbf16>
    %cst_49 = arith.constant dense<0.000000e+00> : vector<16x384xf32>
    %132 = tpu.matmul %131, %4, %cst_49 {dimension_numbers = #tpu.dot_dimension_numbers<[1], [0], [0], [1], [0, 0, 1, 1], [], []>} : vector<16x128xbf16>, vector<128x384xbf16>, vector<16x384xf32> -> vector<16x384xf32>
    %133 = vector.broadcast %5 : vector<1x384xf32> to vector<16x384xf32>
    %134 = arith.addf %132, %133 : vector<16x384xf32>
    %135 = vector.extract_strided_slice %130 {offsets = [0, 0], sizes = [16, 128], strides = [1, 1]} : vector<16x384xf32> to vector<16x128xf32>
    %136 = vector.extract_strided_slice %134 {offsets = [0, 0], sizes = [16, 128], strides = [1, 1]} : vector<16x384xf32> to vector<16x128xf32>
    %137 = arith.addf %135, %136 : vector<16x128xf32>
    %138 = arith.negf %137 : vector<16x128xf32>
    %139 = math.exp %138 : vector<16x128xf32>
    %cst_50 = arith.constant 1.000000e+00 : f32
    %140 = vector.broadcast %cst_50 : f32 to vector<16x128xf32>
    %141 = arith.addf %140, %139 : vector<16x128xf32>
    %142 = arith.divf %140, %141 : vector<16x128xf32>
    %143 = vector.extract_strided_slice %130 {offsets = [0, 128], sizes = [16, 128], strides = [1, 1]} : vector<16x384xf32> to vector<16x128xf32>
    %144 = vector.extract_strided_slice %134 {offsets = [0, 128], sizes = [16, 128], strides = [1, 1]} : vector<16x384xf32> to vector<16x128xf32>
    %145 = arith.addf %143, %144 : vector<16x128xf32>
    %146 = arith.negf %145 : vector<16x128xf32>
    %147 = math.exp %146 : vector<16x128xf32>
    %cst_51 = arith.constant 1.000000e+00 : f32
    %148 = vector.broadcast %cst_51 : f32 to vector<16x128xf32>
    %149 = arith.addf %148, %147 : vector<16x128xf32>
    %150 = arith.divf %148, %149 : vector<16x128xf32>
    %151 = vector.extract_strided_slice %130 {offsets = [0, 256], sizes = [16, 128], strides = [1, 1]} : vector<16x384xf32> to vector<16x128xf32>
    %152 = vector.extract_strided_slice %134 {offsets = [0, 256], sizes = [16, 128], strides = [1, 1]} : vector<16x384xf32> to vector<16x128xf32>
    %153 = arith.mulf %142, %152 : vector<16x128xf32>
    %154 = arith.addf %151, %153 : vector<16x128xf32>
    %155 = math.tanh %154 : vector<16x128xf32>
    %cst_52 = arith.constant 1.000000e+00 : f32
    %156 = vector.broadcast %cst_52 : f32 to vector<16x128xf32>
    %157 = arith.subf %156, %150 : vector<16x128xf32>
    %158 = arith.mulf %157, %155 : vector<16x128xf32>
    %159 = arith.mulf %150, %126 : vector<16x128xf32>
    %160 = arith.addf %158, %159 : vector<16x128xf32>
    %161 = arith.truncf %160 : vector<16x128xf32> to vector<16x128xbf16>
    %c3_53 = arith.constant 3 : index
    %c0_54 = arith.constant 0 : index
    %c0_55 = arith.constant 0 : index
    %162 = vector.load %arg7[%c3_53, %c0_54, %c0_55] : memref<8x16x128xbf16, #tpu.memory_space<vmem>>, vector<1x16x128xbf16>
    %163 = vector.shape_cast %162 : vector<1x16x128xbf16> to vector<16x128xbf16>
    %164 = vector.shape_cast %161 : vector<16x128xbf16> to vector<1x16x128xbf16>
    tpu.vector_store %arg7[%c3_53, %c0_54, %c0_55], %164 {strides = array<i32>} : memref<8x16x128xbf16, #tpu.memory_space<vmem>>, vector<1x16x128xbf16>,
    %c0_56 = arith.constant 0 : index
    %c0_57 = arith.constant 0 : index
    %165 = vector.load %arg9[%c0_56, %c0_57] : memref<16x128xf32, #tpu.memory_space<vmem>>, vector<16x128xf32>
    tpu.vector_store %arg9[%c0_56, %c0_57], %160 {strides = array<i32>} : memref<16x128xf32, #tpu.memory_space<vmem>>, vector<16x128xf32>,
    %c0_58 = arith.constant 0 : index
    %c0_59 = arith.constant 0 : index
    %166 = vector.load %arg9[%c0_58, %c0_59] : memref<16x128xf32, #tpu.memory_space<vmem>>, vector<16x128xf32>
    %c4 = arith.constant 4 : index
    %c0_60 = arith.constant 0 : index
    %c0_61 = arith.constant 0 : index
    %167 = vector.load %arg2[%c4, %c0_60, %c0_61] : memref<8x16x384xbf16, #tpu.memory_space<vmem>>, vector<1x16x384xbf16>
    %168 = vector.shape_cast %167 : vector<1x16x384xbf16> to vector<16x384xbf16>
    %169 = arith.extf %168 : vector<16x384xbf16> to vector<16x384xf32>
    %170 = arith.addf %169, %3 : vector<16x384xf32>
    %171 = arith.truncf %166 : vector<16x128xf32> to vector<16x128xbf16>
    %cst_62 = arith.constant dense<0.000000e+00> : vector<16x384xf32>
    %172 = tpu.matmul %171, %4, %cst_62 {dimension_numbers = #tpu.dot_dimension_numbers<[1], [0], [0], [1], [0, 0, 1, 1], [], []>} : vector<16x128xbf16>, vector<128x384xbf16>, vector<16x384xf32> -> vector<16x384xf32>
    %173 = vector.broadcast %5 : vector<1x384xf32> to vector<16x384xf32>
    %174 = arith.addf %172, %173 : vector<16x384xf32>
    %175 = vector.extract_strided_slice %170 {offsets = [0, 0], sizes = [16, 128], strides = [1, 1]} : vector<16x384xf32> to vector<16x128xf32>
    %176 = vector.extract_strided_slice %174 {offsets = [0, 0], sizes = [16, 128], strides = [1, 1]} : vector<16x384xf32> to vector<16x128xf32>
    %177 = arith.addf %175, %176 : vector<16x128xf32>
    %178 = arith.negf %177 : vector<16x128xf32>
    %179 = math.exp %178 : vector<16x128xf32>
    %cst_63 = arith.constant 1.000000e+00 : f32
    %180 = vector.broadcast %cst_63 : f32 to vector<16x128xf32>
    %181 = arith.addf %180, %179 : vector<16x128xf32>
    %182 = arith.divf %180, %181 : vector<16x128xf32>
    %183 = vector.extract_strided_slice %170 {offsets = [0, 128], sizes = [16, 128], strides = [1, 1]} : vector<16x384xf32> to vector<16x128xf32>
    %184 = vector.extract_strided_slice %174 {offsets = [0, 128], sizes = [16, 128], strides = [1, 1]} : vector<16x384xf32> to vector<16x128xf32>
    %185 = arith.addf %183, %184 : vector<16x128xf32>
    %186 = arith.negf %185 : vector<16x128xf32>
    %187 = math.exp %186 : vector<16x128xf32>
    %cst_64 = arith.constant 1.000000e+00 : f32
    %188 = vector.broadcast %cst_64 : f32 to vector<16x128xf32>
    %189 = arith.addf %188, %187 : vector<16x128xf32>
    %190 = arith.divf %188, %189 : vector<16x128xf32>
    %191 = vector.extract_strided_slice %170 {offsets = [0, 256], sizes = [16, 128], strides = [1, 1]} : vector<16x384xf32> to vector<16x128xf32>
    %192 = vector.extract_strided_slice %174 {offsets = [0, 256], sizes = [16, 128], strides = [1, 1]} : vector<16x384xf32> to vector<16x128xf32>
    %193 = arith.mulf %182, %192 : vector<16x128xf32>
    %194 = arith.addf %191, %193 : vector<16x128xf32>
    %195 = math.tanh %194 : vector<16x128xf32>
    %cst_65 = arith.constant 1.000000e+00 : f32
    %196 = vector.broadcast %cst_65 : f32 to vector<16x128xf32>
    %197 = arith.subf %196, %190 : vector<16x128xf32>
    %198 = arith.mulf %197, %195 : vector<16x128xf32>
    %199 = arith.mulf %190, %166 : vector<16x128xf32>
    %200 = arith.addf %198, %199 : vector<16x128xf32>
    %201 = arith.truncf %200 : vector<16x128xf32> to vector<16x128xbf16>
    %c4_66 = arith.constant 4 : index
    %c0_67 = arith.constant 0 : index
    %c0_68 = arith.constant 0 : index
    %202 = vector.load %arg7[%c4_66, %c0_67, %c0_68] : memref<8x16x128xbf16, #tpu.memory_space<vmem>>, vector<1x16x128xbf16>
    %203 = vector.shape_cast %202 : vector<1x16x128xbf16> to vector<16x128xbf16>
    %204 = vector.shape_cast %201 : vector<16x128xbf16> to vector<1x16x128xbf16>
    tpu.vector_store %arg7[%c4_66, %c0_67, %c0_68], %204 {strides = array<i32>} : memref<8x16x128xbf16, #tpu.memory_space<vmem>>, vector<1x16x128xbf16>,
    %c0_69 = arith.constant 0 : index
    %c0_70 = arith.constant 0 : index
    %205 = vector.load %arg9[%c0_69, %c0_70] : memref<16x128xf32, #tpu.memory_space<vmem>>, vector<16x128xf32>
    tpu.vector_store %arg9[%c0_69, %c0_70], %200 {strides = array<i32>} : memref<16x128xf32, #tpu.memory_space<vmem>>, vector<16x128xf32>,
    %c0_71 = arith.constant 0 : index
    %c0_72 = arith.constant 0 : index
    %206 = vector.load %arg9[%c0_71, %c0_72] : memref<16x128xf32, #tpu.memory_space<vmem>>, vector<16x128xf32>
    %c5 = arith.constant 5 : index
    %c0_73 = arith.constant 0 : index
    %c0_74 = arith.constant 0 : index
    %207 = vector.load %arg2[%c5, %c0_73, %c0_74] : memref<8x16x384xbf16, #tpu.memory_space<vmem>>, vector<1x16x384xbf16>
    %208 = vector.shape_cast %207 : vector<1x16x384xbf16> to vector<16x384xbf16>
    %209 = arith.extf %208 : vector<16x384xbf16> to vector<16x384xf32>
    %210 = arith.addf %209, %3 : vector<16x384xf32>
    %211 = arith.truncf %206 : vector<16x128xf32> to vector<16x128xbf16>
    %cst_75 = arith.constant dense<0.000000e+00> : vector<16x384xf32>
    %212 = tpu.matmul %211, %4, %cst_75 {dimension_numbers = #tpu.dot_dimension_numbers<[1], [0], [0], [1], [0, 0, 1, 1], [], []>} : vector<16x128xbf16>, vector<128x384xbf16>, vector<16x384xf32> -> vector<16x384xf32>
    %213 = vector.broadcast %5 : vector<1x384xf32> to vector<16x384xf32>
    %214 = arith.addf %212, %213 : vector<16x384xf32>
    %215 = vector.extract_strided_slice %210 {offsets = [0, 0], sizes = [16, 128], strides = [1, 1]} : vector<16x384xf32> to vector<16x128xf32>
    %216 = vector.extract_strided_slice %214 {offsets = [0, 0], sizes = [16, 128], strides = [1, 1]} : vector<16x384xf32> to vector<16x128xf32>
    %217 = arith.addf %215, %216 : vector<16x128xf32>
    %218 = arith.negf %217 : vector<16x128xf32>
    %219 = math.exp %218 : vector<16x128xf32>
    %cst_76 = arith.constant 1.000000e+00 : f32
    %220 = vector.broadcast %cst_76 : f32 to vector<16x128xf32>
    %221 = arith.addf %220, %219 : vector<16x128xf32>
    %222 = arith.divf %220, %221 : vector<16x128xf32>
    %223 = vector.extract_strided_slice %210 {offsets = [0, 128], sizes = [16, 128], strides = [1, 1]} : vector<16x384xf32> to vector<16x128xf32>
    %224 = vector.extract_strided_slice %214 {offsets = [0, 128], sizes = [16, 128], strides = [1, 1]} : vector<16x384xf32> to vector<16x128xf32>
    %225 = arith.addf %223, %224 : vector<16x128xf32>
    %226 = arith.negf %225 : vector<16x128xf32>
    %227 = math.exp %226 : vector<16x128xf32>
    %cst_77 = arith.constant 1.000000e+00 : f32
    %228 = vector.broadcast %cst_77 : f32 to vector<16x128xf32>
    %229 = arith.addf %228, %227 : vector<16x128xf32>
    %230 = arith.divf %228, %229 : vector<16x128xf32>
    %231 = vector.extract_strided_slice %210 {offsets = [0, 256], sizes = [16, 128], strides = [1, 1]} : vector<16x384xf32> to vector<16x128xf32>
    %232 = vector.extract_strided_slice %214 {offsets = [0, 256], sizes = [16, 128], strides = [1, 1]} : vector<16x384xf32> to vector<16x128xf32>
    %233 = arith.mulf %222, %232 : vector<16x128xf32>
    %234 = arith.addf %231, %233 : vector<16x128xf32>
    %235 = math.tanh %234 : vector<16x128xf32>
    %cst_78 = arith.constant 1.000000e+00 : f32
    %236 = vector.broadcast %cst_78 : f32 to vector<16x128xf32>
    %237 = arith.subf %236, %230 : vector<16x128xf32>
    %238 = arith.mulf %237, %235 : vector<16x128xf32>
    %239 = arith.mulf %230, %206 : vector<16x128xf32>
    %240 = arith.addf %238, %239 : vector<16x128xf32>
    %241 = arith.truncf %240 : vector<16x128xf32> to vector<16x128xbf16>
    %c5_79 = arith.constant 5 : index
    %c0_80 = arith.constant 0 : index
    %c0_81 = arith.constant 0 : index
    %242 = vector.load %arg7[%c5_79, %c0_80, %c0_81] : memref<8x16x128xbf16, #tpu.memory_space<vmem>>, vector<1x16x128xbf16>
    %243 = vector.shape_cast %242 : vector<1x16x128xbf16> to vector<16x128xbf16>
    %244 = vector.shape_cast %241 : vector<16x128xbf16> to vector<1x16x128xbf16>
    tpu.vector_store %arg7[%c5_79, %c0_80, %c0_81], %244 {strides = array<i32>} : memref<8x16x128xbf16, #tpu.memory_space<vmem>>, vector<1x16x128xbf16>,
    %c0_82 = arith.constant 0 : index
    %c0_83 = arith.constant 0 : index
    %245 = vector.load %arg9[%c0_82, %c0_83] : memref<16x128xf32, #tpu.memory_space<vmem>>, vector<16x128xf32>
    tpu.vector_store %arg9[%c0_82, %c0_83], %240 {strides = array<i32>} : memref<16x128xf32, #tpu.memory_space<vmem>>, vector<16x128xf32>,
    %c0_84 = arith.constant 0 : index
    %c0_85 = arith.constant 0 : index
    %246 = vector.load %arg9[%c0_84, %c0_85] : memref<16x128xf32, #tpu.memory_space<vmem>>, vector<16x128xf32>
    %c6 = arith.constant 6 : index
    %c0_86 = arith.constant 0 : index
    %c0_87 = arith.constant 0 : index
    %247 = vector.load %arg2[%c6, %c0_86, %c0_87] : memref<8x16x384xbf16, #tpu.memory_space<vmem>>, vector<1x16x384xbf16>
    %248 = vector.shape_cast %247 : vector<1x16x384xbf16> to vector<16x384xbf16>
    %249 = arith.extf %248 : vector<16x384xbf16> to vector<16x384xf32>
    %250 = arith.addf %249, %3 : vector<16x384xf32>
    %251 = arith.truncf %246 : vector<16x128xf32> to vector<16x128xbf16>
    %cst_88 = arith.constant dense<0.000000e+00> : vector<16x384xf32>
    %252 = tpu.matmul %251, %4, %cst_88 {dimension_numbers = #tpu.dot_dimension_numbers<[1], [0], [0], [1], [0, 0, 1, 1], [], []>} : vector<16x128xbf16>, vector<128x384xbf16>, vector<16x384xf32> -> vector<16x384xf32>
    %253 = vector.broadcast %5 : vector<1x384xf32> to vector<16x384xf32>
    %254 = arith.addf %252, %253 : vector<16x384xf32>
    %255 = vector.extract_strided_slice %250 {offsets = [0, 0], sizes = [16, 128], strides = [1, 1]} : vector<16x384xf32> to vector<16x128xf32>
    %256 = vector.extract_strided_slice %254 {offsets = [0, 0], sizes = [16, 128], strides = [1, 1]} : vector<16x384xf32> to vector<16x128xf32>
    %257 = arith.addf %255, %256 : vector<16x128xf32>
    %258 = arith.negf %257 : vector<16x128xf32>
    %259 = math.exp %258 : vector<16x128xf32>
    %cst_89 = arith.constant 1.000000e+00 : f32
    %260 = vector.broadcast %cst_89 : f32 to vector<16x128xf32>
    %261 = arith.addf %260, %259 : vector<16x128xf32>
    %262 = arith.divf %260, %261 : vector<16x128xf32>
    %263 = vector.extract_strided_slice %250 {offsets = [0, 128], sizes = [16, 128], strides = [1, 1]} : vector<16x384xf32> to vector<16x128xf32>
    %264 = vector.extract_strided_slice %254 {offsets = [0, 128], sizes = [16, 128], strides = [1, 1]} : vector<16x384xf32> to vector<16x128xf32>
    %265 = arith.addf %263, %264 : vector<16x128xf32>
    %266 = arith.negf %265 : vector<16x128xf32>
    %267 = math.exp %266 : vector<16x128xf32>
    %cst_90 = arith.constant 1.000000e+00 : f32
    %268 = vector.broadcast %cst_90 : f32 to vector<16x128xf32>
    %269 = arith.addf %268, %267 : vector<16x128xf32>
    %270 = arith.divf %268, %269 : vector<16x128xf32>
    %271 = vector.extract_strided_slice %250 {offsets = [0, 256], sizes = [16, 128], strides = [1, 1]} : vector<16x384xf32> to vector<16x128xf32>
    %272 = vector.extract_strided_slice %254 {offsets = [0, 256], sizes = [16, 128], strides = [1, 1]} : vector<16x384xf32> to vector<16x128xf32>
    %273 = arith.mulf %262, %272 : vector<16x128xf32>
    %274 = arith.addf %271, %273 : vector<16x128xf32>
    %275 = math.tanh %274 : vector<16x128xf32>
    %cst_91 = arith.constant 1.000000e+00 : f32
    %276 = vector.broadcast %cst_91 : f32 to vector<16x128xf32>
    %277 = arith.subf %276, %270 : vector<16x128xf32>
    %278 = arith.mulf %277, %275 : vector<16x128xf32>
    %279 = arith.mulf %270, %246 : vector<16x128xf32>
    %280 = arith.addf %278, %279 : vector<16x128xf32>
    %281 = arith.truncf %280 : vector<16x128xf32> to vector<16x128xbf16>
    %c6_92 = arith.constant 6 : index
    %c0_93 = arith.constant 0 : index
    %c0_94 = arith.constant 0 : index
    %282 = vector.load %arg7[%c6_92, %c0_93, %c0_94] : memref<8x16x128xbf16, #tpu.memory_space<vmem>>, vector<1x16x128xbf16>
    %283 = vector.shape_cast %282 : vector<1x16x128xbf16> to vector<16x128xbf16>
    %284 = vector.shape_cast %281 : vector<16x128xbf16> to vector<1x16x128xbf16>
    tpu.vector_store %arg7[%c6_92, %c0_93, %c0_94], %284 {strides = array<i32>} : memref<8x16x128xbf16, #tpu.memory_space<vmem>>, vector<1x16x128xbf16>,
    %c0_95 = arith.constant 0 : index
    %c0_96 = arith.constant 0 : index
    %285 = vector.load %arg9[%c0_95, %c0_96] : memref<16x128xf32, #tpu.memory_space<vmem>>, vector<16x128xf32>
    tpu.vector_store %arg9[%c0_95, %c0_96], %280 {strides = array<i32>} : memref<16x128xf32, #tpu.memory_space<vmem>>, vector<16x128xf32>,
    %c0_97 = arith.constant 0 : index
    %c0_98 = arith.constant 0 : index
    %286 = vector.load %arg9[%c0_97, %c0_98] : memref<16x128xf32, #tpu.memory_space<vmem>>, vector<16x128xf32>
    %c7 = arith.constant 7 : index
    %c0_99 = arith.constant 0 : index
    %c0_100 = arith.constant 0 : index
    %287 = vector.load %arg2[%c7, %c0_99, %c0_100] : memref<8x16x384xbf16, #tpu.memory_space<vmem>>, vector<1x16x384xbf16>
    %288 = vector.shape_cast %287 : vector<1x16x384xbf16> to vector<16x384xbf16>
    %289 = arith.extf %288 : vector<16x384xbf16> to vector<16x384xf32>
    %290 = arith.addf %289, %3 : vector<16x384xf32>
    %291 = arith.truncf %286 : vector<16x128xf32> to vector<16x128xbf16>
    %cst_101 = arith.constant dense<0.000000e+00> : vector<16x384xf32>
    %292 = tpu.matmul %291, %4, %cst_101 {dimension_numbers = #tpu.dot_dimension_numbers<[1], [0], [0], [1], [0, 0, 1, 1], [], []>} : vector<16x128xbf16>, vector<128x384xbf16>, vector<16x384xf32> -> vector<16x384xf32>
    %293 = vector.broadcast %5 : vector<1x384xf32> to vector<16x384xf32>
    %294 = arith.addf %292, %293 : vector<16x384xf32>
    %295 = vector.extract_strided_slice %290 {offsets = [0, 0], sizes = [16, 128], strides = [1, 1]} : vector<16x384xf32> to vector<16x128xf32>
    %296 = vector.extract_strided_slice %294 {offsets = [0, 0], sizes = [16, 128], strides = [1, 1]} : vector<16x384xf32> to vector<16x128xf32>
    %297 = arith.addf %295, %296 : vector<16x128xf32>
    %298 = arith.negf %297 : vector<16x128xf32>
    %299 = math.exp %298 : vector<16x128xf32>
    %cst_102 = arith.constant 1.000000e+00 : f32
    %300 = vector.broadcast %cst_102 : f32 to vector<16x128xf32>
    %301 = arith.addf %300, %299 : vector<16x128xf32>
    %302 = arith.divf %300, %301 : vector<16x128xf32>
    %303 = vector.extract_strided_slice %290 {offsets = [0, 128], sizes = [16, 128], strides = [1, 1]} : vector<16x384xf32> to vector<16x128xf32>
    %304 = vector.extract_strided_slice %294 {offsets = [0, 128], sizes = [16, 128], strides = [1, 1]} : vector<16x384xf32> to vector<16x128xf32>
    %305 = arith.addf %303, %304 : vector<16x128xf32>
    %306 = arith.negf %305 : vector<16x128xf32>
    %307 = math.exp %306 : vector<16x128xf32>
    %cst_103 = arith.constant 1.000000e+00 : f32
    %308 = vector.broadcast %cst_103 : f32 to vector<16x128xf32>
    %309 = arith.addf %308, %307 : vector<16x128xf32>
    %310 = arith.divf %308, %309 : vector<16x128xf32>
    %311 = vector.extract_strided_slice %290 {offsets = [0, 256], sizes = [16, 128], strides = [1, 1]} : vector<16x384xf32> to vector<16x128xf32>
    %312 = vector.extract_strided_slice %294 {offsets = [0, 256], sizes = [16, 128], strides = [1, 1]} : vector<16x384xf32> to vector<16x128xf32>
    %313 = arith.mulf %302, %312 : vector<16x128xf32>
    %314 = arith.addf %311, %313 : vector<16x128xf32>
    %315 = math.tanh %314 : vector<16x128xf32>
    %cst_104 = arith.constant 1.000000e+00 : f32
    %316 = vector.broadcast %cst_104 : f32 to vector<16x128xf32>
    %317 = arith.subf %316, %310 : vector<16x128xf32>
    %318 = arith.mulf %317, %315 : vector<16x128xf32>
    %319 = arith.mulf %310, %286 : vector<16x128xf32>
    %320 = arith.addf %318, %319 : vector<16x128xf32>
    %321 = arith.truncf %320 : vector<16x128xf32> to vector<16x128xbf16>
    %c7_105 = arith.constant 7 : index
    %c0_106 = arith.constant 0 : index
    %c0_107 = arith.constant 0 : index
    %322 = vector.load %arg7[%c7_105, %c0_106, %c0_107] : memref<8x16x128xbf16, #tpu.memory_space<vmem>>, vector<1x16x128xbf16>
    %323 = vector.shape_cast %322 : vector<1x16x128xbf16> to vector<16x128xbf16>
    %324 = vector.shape_cast %321 : vector<16x128xbf16> to vector<1x16x128xbf16>
    tpu.vector_store %arg7[%c7_105, %c0_106, %c0_107], %324 {strides = array<i32>} : memref<8x16x128xbf16, #tpu.memory_space<vmem>>, vector<1x16x128xbf16>,
    %c0_108 = arith.constant 0 : index
    %c0_109 = arith.constant 0 : index
    %325 = vector.load %arg9[%c0_108, %c0_109] : memref<16x128xf32, #tpu.memory_space<vmem>>, vector<16x128xf32>
    tpu.vector_store %arg9[%c0_108, %c0_109], %320 {strides = array<i32>} : memref<16x128xf32, #tpu.memory_space<vmem>>, vector<16x128xf32>,
    %c0_110 = arith.constant 0 : index
    %c0_111 = arith.constant 0 : index
    %326 = vector.load %arg9[%c0_110, %c0_111] : memref<16x128xf32, #tpu.memory_space<vmem>>, vector<16x128xf32>
    %c0_112 = arith.constant 0 : index
    %c0_113 = arith.constant 0 : index
    %327 = vector.load %arg8[%c0_112, %c0_113] : memref<16x128xf32, #tpu.memory_space<vmem>>, vector<16x128xf32>
    tpu.vector_store %arg8[%c0_112, %c0_113], %326 {strides = array<i32>} : memref<16x128xf32, #tpu.memory_space<vmem>>, vector<16x128xf32>,
    return
  }
  func.func @transform_0(%arg0: i32, %arg1: i32) -> (i32, i32, i32) {
    %c0_i32 = arith.constant 0 : i32
    %c0_i32_0 = arith.constant 0 : i32
    return %arg1, %arg0, %c0_i32 : i32, i32, i32
  }
  func.func @transform_1(%arg0: i32, %arg1: i32) -> (i32, i32) {
    %c0_i32 = arith.constant 0 : i32
    %c0_i32_0 = arith.constant 0 : i32
    return %arg0, %c0_i32 : i32, i32
  }
  func.func @transform_2(%arg0: i32, %arg1: i32) -> (i32, i32) {
    %c0_i32 = arith.constant 0 : i32
    %c0_i32_0 = arith.constant 0 : i32
    return %arg0, %c0_i32 : i32, i32
  }
  func.func @transform_3(%arg0: i32, %arg1: i32) -> (i32, i32) {
    %c0_i32 = arith.constant 0 : i32
    %c0_i32_0 = arith.constant 0 : i32
    %c0_i32_1 = arith.constant 0 : i32
    return %c0_i32, %c0_i32_0 : i32, i32
  }
  func.func @transform_4(%arg0: i32, %arg1: i32) -> (i32, i32) {
    %c0_i32 = arith.constant 0 : i32
    %c0_i32_0 = arith.constant 0 : i32
    %c0_i32_1 = arith.constant 0 : i32
    return %c0_i32, %c0_i32_0 : i32, i32
  }
  func.func @transform_5(%arg0: i32, %arg1: i32) -> (i32, i32, i32) {
    %c0_i32 = arith.constant 0 : i32
    %c0_i32_0 = arith.constant 0 : i32
    return %arg1, %arg0, %c0_i32 : i32, i32, i32
  }
  func.func @transform_6(%arg0: i32, %arg1: i32) -> (i32, i32) {
    %c0_i32 = arith.constant 0 : i32
    %c0_i32_0 = arith.constant 0 : i32
    return %arg0, %c0_i32 : i32, i32
  }
}

</mosaic_0001>

<bundles_post_ra>
// kernel: _lambda_.4
= control target key start
LH: loop header
LB: loop body
LE: loop exit
PB: predicated region body
PF: predicated region fallthrough
CT: control target
= control target key end

     0   :  { %v1142_v1 = vmov 0   ;;  %v698_v33 = vlaneseq  ;;  %s1420_s1 = inlined_call_operand.vmem [shape: bf16[128,384], index: 1, kind: input, shape index: {}]   ;;  %s1421_s0 = inlined_call_operand.vmem [shape: bf16[128,128], index: 0, kind: input, shape index: {}]   ;;  %s1422_s2 = inlined_call_operand.vmem [shape: f32[1,384], index: 2, kind: input, shape index: {}]   ;;  %s1423_s3 = inlined_call_operand.vmem [shape: bf16[128,384], index: 3, kind: output, shape index: {}]  }
   0x1   :  { %v1102_v0 = vld [vmem:[%s1420_s1 + $0x4] ss:$12 sps:$4 sm:$0xff]   ;;  %371 = vmatprep.mubr.bf16.mxu0 %v1142_v1  ;;  %v1104_v2 = vld [vmem:[%s1420_s1] ss:$12 sps:$4 sm:$0xff]   ;;  %v1105_v3 = vld [vmem:[%s1420_s1 + $0x1c] ss:$12 sps:$4 sm:$0xff]  }
   0x2   :  { %339 = vmatprep.subr.bf16.mxu0 %v1102_v0  ;;  %v1107_v4 = vld [vmem:[%s1420_s1 + $0x18] ss:$12 sps:$4 sm:$0xff]   ;;  %v1108_v5 = vld [vmem:[%s1420_s1 + $0x34] ss:$12 sps:$4 sm:$0xff]   ;;  %v1110_v6 = vld [vmem:[%s1420_s1 + $0x30] ss:$12 sps:$4 sm:$0xff]  }
   0x3   :  { %340 = vmatpush1.bf16.msra.mxu0 %v1104_v2  ;;  %v1111_v7 = vld [vmem:[%s1420_s1 + $0x4c] ss:$12 sps:$4 sm:$0xff]   ;;  %v1113_v8 = vld [vmem:[%s1420_s1 + $0x48] ss:$12 sps:$4 sm:$0xff]   ;;  %v1114_v9 = vld [vmem:[%s1420_s1 + $0x64] ss:$12 sps:$4 sm:$0xff]  }
   0x4   :  { %341 = vmatprep.subr.bf16.mxu0 %v1105_v3  ;;  %v1126_v10 = vld [vmem:[%s1420_s1 + $0x8] ss:$12 sps:$4 sm:$0xff]   ;;  %v1127_v11 = vld [vmem:[%s1421_s0] sm:$0xff]   ;;  %v1131_v17 = vld [vmem:[%s1420_s1 + $0x50] ss:$12 sps:$4 sm:$0xff]   ;;  %v699_v34 = vshrl.u32 %v698_v33, 7 }
   0x5   :  { %1069 = vmatprep.subr.bf16.mxu1 %v1126_v10  ;;  %v1128_v12 = vld [vmem:[%s1420_s1 + $0x20] ss:$12 sps:$4 sm:$0xff]   ;;  %1085 = vmatprep.mubr.bf16.mxu1 %v1127_v11  ;;  %v1129_v14 = vld [vmem:[%s1420_s1 + $0x38] ss:$12 sps:$4 sm:$0xff]   ;;  %v1117_v15 = vld [vmem:[%s1420_s1 + $0x7c] ss:$12 sps:$4 sm:$0xff]  }
   0x6   :  { %v1116_v13 = vld [vmem:[%s1420_s1 + $0x60] ss:$12 sps:$4 sm:$0xff]   ;;  %1070 = vmatpush3.bf16.msra.mxu1 %v1126_v10  ;;  %v1119_v16 = vld [vmem:[%s1420_s1 + $0x78] ss:$12 sps:$4 sm:$0xff]   ;;  %v1122_v19 = vld [vmem:[%s1420_s1 + $0x90] ss:$12 sps:$4 sm:$0xff]  }
   0x7   :  { %342 = vmatpush1.bf16.msra.mxu0 %v1107_v4  ;;  %1071 = vmatprep.subr.bf16.mxu1 %v1128_v12  ;;  %v1120_v18 = vld [vmem:[%s1420_s1 + $0x94] ss:$12 sps:$4 sm:$0xff]   ;;  %v1123_v21 = vld [vmem:[%s1420_s1 + $0xac] ss:$12 sps:$4 sm:$0xff]   ;;  %v1137_v25 = vld [vmem:[%s1420_s1 + $0xb0] ss:$12 sps:$4 sm:$0xff]  }
   0x8   :  { %343 = vmatprep.subr.bf16.mxu0 %v1108_v5  ;;  %v1132_v20 = vld [vmem:[%s1420_s1 + $0x68] ss:$12 sps:$4 sm:$0xff]   ;;  %v1134_v23 = vld [vmem:[%s1420_s1 + $0x80] ss:$12 sps:$4 sm:$0xff]   ;;  %v1135_v24 = vld [vmem:[%s1420_s1 + $0x98] ss:$12 sps:$4 sm:$0xff]  }
   0x9   :  { %v1125_v22 = vld [vmem:[%s1420_s1 + $0xa8] ss:$12 sps:$4 sm:$0xff]   ;;  %v1136_v28 = vld [vmem:[%s1421_s0 + $0x18] sm:$0xff]   ;;  %v1138_v29 = vld [vmem:[%s1421_s0 + $0x20] sm:$0xff]   ;;  %v700_v35 = vsub.s32 0, %v699_v34  ;;  %v704_v37 = vsub.s32 1, %v699_v34 }
   0xa   :  { %1072 = vmatpush3.bf16.msra.mxu1 %v1128_v12  ;;  %v1130_v26 = vld [vmem:[%s1421_s0 + $0x8] sm:$0xff]   ;;  %v1133_v27 = vld [vmem:[%s1421_s0 + $0x10] sm:$0xff]   ;;  %v1141_v32 = vld [vmem:[%s1421_s0 + $0x38] sm:$0xff]   ;;  %v708_v49 = vsub.s32 2, %v699_v34 }
   0xb   :  { %344 = vmatpush1.bf16.msra.mxu0 %v1110_v6  ;;  %1073 = vmatprep.subr.bf16.mxu1 %v1129_v14  ;;  %v1139_v30 = vld [vmem:[%s1421_s0 + $0x28] sm:$0xff]   ;;  %v1140_v31 = vld [vmem:[%s1421_s0 + $0x30] sm:$0xff]   ;;  %v696_v36 = vld [vmem:[%s1422_s2] sm:$0x7] }
   0xc   :  { %345 = vmatprep.subr.bf16.mxu0 %v1111_v7  ;;  %v1270_v38 = vrot.slane %v696_v36, %v700_v35  ;;  %v1272_v39 = vrot.slane %v696_v36, %v704_v37  ;;  %v1284_v52 = vrot.slane %v696_v36, %v708_v49 }
   0xe   :  { %1074 = vmatpush3.bf16.msra.mxu1 %v1129_v14 }
   0xf   :  { %346 = vmatpush1.bf16.msra.mxu0 %v1113_v8  ;;  %1075 = vmatprep.subr.bf16.mxu1 %v1131_v17 }
  0x10   :  { %347 = vmatprep.subr.bf16.mxu0 %v1114_v9 }
  0x12   :  { %1076 = vmatpush3.bf16.msra.mxu1 %v1131_v17 }
  0x13   :  { %348 = vmatpush1.bf16.msra.mxu0 %v1116_v13  ;;  %1077 = vmatprep.subr.bf16.mxu1 %v1132_v20 }
  0x14   :  { %349 = vmatprep.subr.bf16.mxu0 %v1117_v15 }
  0x16   :  { %1078 = vmatpush3.bf16.msra.mxu1 %v1132_v20 }
  0x17   :  { %350 = vmatpush1.bf16.msra.mxu0 %v1119_v16  ;;  %1079 = vmatprep.subr.bf16.mxu1 %v1134_v23 }
  0x18   :  { %351 = vmatprep.subr.bf16.mxu0 %v1120_v18 }
  0x1a   :  { %1080 = vmatpush3.bf16.msra.mxu1 %v1134_v23 }
  0x1b   :  { %352 = vmatpush1.bf16.msra.mxu0 %v1122_v19  ;;  %1081 = vmatprep.subr.bf16.mxu1 %v1135_v24 }
  0x1c   :  { %353 = vmatprep.subr.bf16.mxu0 %v1123_v21 }
  0x1e   :  { %1082 = vmatpush3.bf16.msra.mxu1 %v1135_v24 }
  0x1f   :  { %354 = vmatpush1.bf16.msra.mxu0 %v1125_v22  ;;  %1083 = vmatprep.subr.bf16.mxu1 %v1137_v25 }
  0x22   :  { %372 = vmatmul.mubr.bf16.vlgmr.msra.gmra.mrb[0].mxu0 %v1127_v11  ;;  %1084 = vmatpush3.bf16.msra.mxu1 %v1137_v25 }
  0x23   :  { %381 = vmatprep.mubr.bf16.mxu0 %v1142_v1 }
  0x25   :  { %1086 = vmatmul.mubr.bf16.vlgmr.msra.gmra.mrb[0].mxu1 %v1130_v26 }
  0x26   :  { %1089 = vmatprep.mubr.bf16.mxu1 %v1133_v27 }
  0x2a   :  { %382 = vmatmul.mubr.bf16.gmra.mrb[4].mxu0 %v1130_v26 }
  0x2b   :  { %391 = vmatprep.mubr.bf16.mxu0 %v1142_v1 }
  0x2d   :  { %1090 = vmatmul.mubr.bf16.gmra.mrb[4].mxu1 %v1136_v28 }
  0x2e   :  { %1093 = vmatprep.mubr.bf16.mxu1 %v1138_v29 }
  0x32   :  { %392 = vmatmul.mubr.bf16.gmra.mrb[8].mxu0 %v1133_v27 }
  0x33   :  { %401 = vmatprep.mubr.bf16.mxu0 %v1142_v1 }
  0x35   :  { %1094 = vmatmul.mubr.bf16.gmra.mrb[8].mxu1 %v1139_v30 }
  0x36   :  { %1097 = vmatprep.mubr.bf16.mxu1 %v1140_v31 }
  0x3a   :  { %402 = vmatmul.mubr.bf16.gmra.mrb[12].mxu0 %v1136_v28 }
  0x3b   :  { %411 = vmatprep.mubr.bf16.mxu0 %v1142_v1 }
  0x3d   :  { %1098 = vmatmul.mubr.bf16.gmra.mrb[12].mxu1 %v1141_v32 }
  0x42   :  { %412 = vmatmul.mubr.bf16.gmra.mrb[16].mxu0 %v1138_v29 }
  0x43   :  { %421 = vmatprep.mubr.bf16.mxu0 %v1142_v1 }
  0x4a   :  { %422 = vmatmul.mubr.bf16.gmra.mrb[20].mxu0 %v1139_v30 }
  0x4b   :  { %431 = vmatprep.mubr.bf16.mxu0 %v1142_v1 }
  0x52   :  { %432 = vmatmul.mubr.bf16.gmra.mrb[24].mxu0 %v1140_v31 }
  0x53   :  { %441 = vmatprep.mubr.bf16.mxu0 %v1142_v1 }
  0x5a   :  { %442 = vmatmul.mubr.bf16.gmra.mrb[28].mxu0 %v1141_v32 }
  0xf5   :  { %v373_v40 = vpop.f32.mrb[0].mxu0 }
  0xf6   :  { %v713_v41 = vadd.f32 %v1270_v38, %v373_v40  ;;  %v375_v42 = vpop.f32.mrb[1].mxu0 }
  0xf7   :  { %v714_v43 = vadd.f32 %v1272_v39, %v375_v42  ;;  %v377_v44 = vpop.f32.mrb[2].mxu0 }
  0xf8   :  { %v716_v45 = vadd.f32 %v1270_v38, %v377_v44  ;;  %v379_v46 = vpop.f32.mrb[3].mxu0  ;;  %v1087_v59 = vpop.f32.mrb[0].mxu1 }
  0xf9   :  { %v1021_v47 = vpack.c.bf16 %v714_v43, %v713_v41  ;;  %v717_v48 = vadd.f32 %v1272_v39, %v379_v46  ;;  %v721_v62 = vadd.f32 %v1087_v59, %v1284_v52  ;;  %v486_v63 = vpop.f32.mrb[1].mxu1 }
  0xfa   :  { %v715_v0 = vadd.f32 %v1284_v52, %v486_v63  ;;  %v1088_v1 = vpop.f32.mrb[2].mxu1 }
  0xfb   :  { %921 = vst [vmem:[%s1423_s3] sm:$0xff] %v1021_v47  ;;  %v1023_v50 = vpack.c.bf16 %v717_v48, %v716_v45  ;;  %v1026_v3 = vpack.c.bf16 %v721_v62, %v721_v62  ;;  %v724_v4 = vadd.f32 %v1088_v1, %v1284_v52  ;;  %v489_v5 = vpop.f32.mrb[3].mxu1 }
  0xfc   :  { %v1022_v6 = vpack.c.bf16 %v715_v0, %v715_v0  ;;  %v718_v7 = vadd.f32 %v1284_v52, %v489_v5 }
  0xfd   :  { %923 = vst [vmem:[%s1423_s3 + $0xc] sm:$0xff] %v1023_v50  ;;  %v383_v51 = vpop.f32.mrb[4].mxu0  ;;  %926 = vst [vmem:[%s1423_s3 + $0x20] sm:$0xf] %v1026_v3  ;;  %v1028_v9 = vpack.c.bf16 %v724_v4, %v724_v4 }
  0xfe   :  { %v719_v53 = vadd.f32 %v1270_v38, %v383_v51  ;;  %v385_v54 = vpop.f32.mrb[5].mxu0  ;;  %922 = vst [vmem:[%s1423_s3 + $0x8] sm:$0xf] %v1022_v6  ;;  %v1024_v12 = vpack.c.bf16 %v718_v7, %v718_v7 }
  0xff   :  { %v720_v55 = vadd.f32 %v1272_v39, %v385_v54  ;;  %v387_v56 = vpop.f32.mrb[6].mxu0  ;;  %928 = vst [vmem:[%s1423_s3 + $0x2c] sm:$0xf] %v1028_v9 }
 0x100   :  { %v722_v57 = vadd.f32 %v1270_v38, %v387_v56  ;;  %v389_v58 = vpop.f32.mrb[7].mxu0  ;;  %924 = vst [vmem:[%s1423_s3 + $0x14] sm:$0xf] %v1024_v12  ;;  %v1091_v17 = vpop.f32.mrb[4].mxu1 }
 0x101   :  { %v1025_v60 = vpack.c.bf16 %v720_v55, %v719_v53  ;;  %v723_v61 = vadd.f32 %v1272_v39, %v389_v58  ;;  %v733_v20 = vadd.f32 %v1091_v17, %v1284_v52  ;;  %v502_v21 = vpop.f32.mrb[5].mxu1 }
 0x102   :  { %v727_v22 = vadd.f32 %v1284_v52, %v502_v21  ;;  %v1092_v23 = vpop.f32.mrb[6].mxu1 }
 0x103   :  { %925 = vst [vmem:[%s1423_s3 + $0x18] sm:$0xff] %v1025_v60  ;;  %v1027_v2 = vpack.c.bf16 %v723_v61, %v722_v57  ;;  %v1034_v25 = vpack.c.bf16 %v733_v20, %v733_v20  ;;  %v736_v26 = vadd.f32 %v1092_v23, %v1284_v52  ;;  %v505_v27 = vpop.f32.mrb[7].mxu1 }
 0x104   :  { %v1030_v28 = vpack.c.bf16 %v727_v22, %v727_v22  ;;  %v730_v29 = vadd.f32 %v1284_v52, %v505_v27 }
 0x105   :  { %927 = vst [vmem:[%s1423_s3 + $0x24] sm:$0xff] %v1027_v2  ;;  %v393_v8 = vpop.f32.mrb[8].mxu0  ;;  %934 = vst [vmem:[%s1423_s3 + $0x50] sm:$0xf] %v1034_v25  ;;  %v1036_v31 = vpack.c.bf16 %v736_v26, %v736_v26 }
 0x106   :  { %v725_v10 = vadd.f32 %v1270_v38, %v393_v8  ;;  %v395_v11 = vpop.f32.mrb[9].mxu0  ;;  %930 = vst [vmem:[%s1423_s3 + $0x38] sm:$0xf] %v1030_v28  ;;  %v1032_v34 = vpack.c.bf16 %v730_v29, %v730_v29 }
 0x107   :  { %v726_v13 = vadd.f32 %v1272_v39, %v395_v11  ;;  %v397_v14 = vpop.f32.mrb[10].mxu0  ;;  %936 = vst [vmem:[%s1423_s3 + $0x5c] sm:$0xf] %v1036_v31 }
 0x108   :  { %v728_v15 = vadd.f32 %v1270_v38, %v397_v14  ;;  %v399_v16 = vpop.f32.mrb[11].mxu0  ;;  %932 = vst [vmem:[%s1423_s3 + $0x44] sm:$0xf] %v1032_v34  ;;  %v1095_v41 = vpop.f32.mrb[8].mxu1 }
 0x109   :  { %v1029_v18 = vpack.c.bf16 %v726_v13, %v725_v10  ;;  %v729_v19 = vadd.f32 %v1272_v39, %v399_v16  ;;  %v745_v44 = vadd.f32 %v1095_v41, %v1284_v52  ;;  %v518_v45 = vpop.f32.mrb[9].mxu1 }
 0x10a   :  { %v739_v46 = vadd.f32 %v1284_v52, %v518_v45  ;;  %v1096_v47 = vpop.f32.mrb[10].mxu1 }
 0x10b   :  { %929 = vst [vmem:[%s1423_s3 + $0x30] sm:$0xff] %v1029_v18  ;;  %v1031_v24 = vpack.c.bf16 %v729_v19, %v728_v15  ;;  %v1042_v49 = vpack.c.bf16 %v745_v44, %v745_v44  ;;  %v748_v50 = vadd.f32 %v1096_v47, %v1284_v52  ;;  %v521_v51 = vpop.f32.mrb[11].mxu1 }
 0x10c   :  { %v1038_v53 = vpack.c.bf16 %v739_v46, %v739_v46  ;;  %v742_v54 = vadd.f32 %v1284_v52, %v521_v51 }
 0x10d   :  { %931 = vst [vmem:[%s1423_s3 + $0x3c] sm:$0xff] %v1031_v24  ;;  %v403_v30 = vpop.f32.mrb[12].mxu0  ;;  %942 = vst [vmem:[%s1423_s3 + $0x80] sm:$0xf] %v1042_v49  ;;  %v1044_v56 = vpack.c.bf16 %v748_v50, %v748_v50 }
 0x10e   :  { %v731_v32 = vadd.f32 %v1270_v38, %v403_v30  ;;  %v405_v33 = vpop.f32.mrb[13].mxu0  ;;  %938 = vst [vmem:[%s1423_s3 + $0x68] sm:$0xf] %v1038_v53  ;;  %v1040_v59 = vpack.c.bf16 %v742_v54, %v742_v54 }
 0x10f   :  { %v732_v35 = vadd.f32 %v1272_v39, %v405_v33  ;;  %v407_v36 = vpop.f32.mrb[14].mxu0  ;;  %944 = vst [vmem:[%s1423_s3 + $0x8c] sm:$0xf] %v1044_v56 }
 0x110   :  { %v734_v37 = vadd.f32 %v1270_v38, %v407_v36  ;;  %v409_v40 = vpop.f32.mrb[15].mxu0  ;;  %940 = vst [vmem:[%s1423_s3 + $0x74] sm:$0xf] %v1040_v59  ;;  %v1099_v0 = vpop.f32.mrb[12].mxu1 }
 0x111   :  { %v1033_v42 = vpack.c.bf16 %v732_v35, %v731_v32  ;;  %v735_v43 = vadd.f32 %v1272_v39, %v409_v40  ;;  %v757_v3 = vadd.f32 %v1099_v0, %v1284_v52  ;;  %v534_v4 = vpop.f32.mrb[13].mxu1 }
 0x112   :  { %v751_v5 = vadd.f32 %v1284_v52, %v534_v4  ;;  %v1100_v6 = vpop.f32.mrb[14].mxu1 }
 0x113   :  { %933 = vst [vmem:[%s1423_s3 + $0x48] sm:$0xff] %v1033_v42  ;;  %v1035_v48 = vpack.c.bf16 %v735_v43, %v734_v37  ;;  %v1050_v8 = vpack.c.bf16 %v757_v3, %v757_v3  ;;  %v760_v9 = vadd.f32 %v1100_v6, %v1284_v52  ;;  %v537_v10 = vpop.f32.mrb[15].mxu1 }
 0x114   :  { %v1046_v11 = vpack.c.bf16 %v751_v5, %v751_v5  ;;  %v754_v12 = vadd.f32 %v1284_v52, %v537_v10 }
 0x115   :  { %935 = vst [vmem:[%s1423_s3 + $0x54] sm:$0xff] %v1035_v48  ;;  %v413_v55 = vpop.f32.mrb[16].mxu0  ;;  %950 = vst [vmem:[%s1423_s3 + $0xb0] sm:$0xf] %v1050_v8  ;;  %v1052_v14 = vpack.c.bf16 %v760_v9, %v760_v9 }
 0x116   :  { %v737_v57 = vadd.f32 %v1270_v38, %v413_v55  ;;  %v415_v58 = vpop.f32.mrb[17].mxu0  ;;  %946 = vst [vmem:[%s1423_s3 + $0x98] sm:$0xf] %v1046_v11  ;;  %v1048_v17 = vpack.c.bf16 %v754_v12, %v754_v12 }
 0x117   :  { %v738_v60 = vadd.f32 %v1272_v39, %v415_v58  ;;  %v417_v61 = vpop.f32.mrb[18].mxu0  ;;  %952 = vst [vmem:[%s1423_s3 + $0xbc] sm:$0xf] %v1052_v14 }
 0x118   :  { %v740_v62 = vadd.f32 %v1270_v38, %v417_v61  ;;  %v419_v63 = vpop.f32.mrb[19].mxu0  ;;  %948 = vst [vmem:[%s1423_s3 + $0xa4] sm:$0xf] %v1048_v17 }
 0x119   :  { %v1037_v1 = vpack.c.bf16 %v738_v60, %v737_v57  ;;  %v741_v2 = vadd.f32 %v1272_v39, %v419_v63 }
 0x11b   :  { %937 = vst [vmem:[%s1423_s3 + $0x60] sm:$0xff] %v1037_v1  ;;  %v1039_v7 = vpack.c.bf16 %v741_v2, %v740_v62 }
 0x11d   :  { %939 = vst [vmem:[%s1423_s3 + $0x6c] sm:$0xff] %v1039_v7  ;;  %v423_v13 = vpop.f32.mrb[20].mxu0 }
 0x11e   :  { %v743_v15 = vadd.f32 %v1270_v38, %v423_v13  ;;  %v425_v16 = vpop.f32.mrb[21].mxu0 }
 0x11f   :  { %v744_v52 = vadd.f32 %v1272_v39, %v425_v16  ;;  %v427_v18 = vpop.f32.mrb[22].mxu0 }
 0x120   :  { %v746_v19 = vadd.f32 %v1270_v38, %v427_v18  ;;  %v429_v20 = vpop.f32.mrb[23].mxu0 }
 0x121   :  { %v1041_v21 = vpack.c.bf16 %v744_v52, %v743_v15  ;;  %v747_v22 = vadd.f32 %v1272_v39, %v429_v20 }
 0x123   :  { %941 = vst [vmem:[%s1423_s3 + $0x78] sm:$0xff] %v1041_v21  ;;  %v1043_v23 = vpack.c.bf16 %v747_v22, %v746_v19 }
 0x125   :  { %943 = vst [vmem:[%s1423_s3 + $0x84] sm:$0xff] %v1043_v23  ;;  %v433_v24 = vpop.f32.mrb[24].mxu0 }
 0x126   :  { %v749_v25 = vadd.f32 %v1270_v38, %v433_v24  ;;  %v435_v26 = vpop.f32.mrb[25].mxu0 }
 0x127   :  { %v750_v27 = vadd.f32 %v1272_v39, %v435_v26  ;;  %v437_v28 = vpop.f32.mrb[26].mxu0 }
 0x128   :  { %v752_v29 = vadd.f32 %v1270_v38, %v437_v28  ;;  %v439_v30 = vpop.f32.mrb[27].mxu0 }
 0x129   :  { %v1045_v31 = vpack.c.bf16 %v750_v27, %v749_v25  ;;  %v753_v32 = vadd.f32 %v1272_v39, %v439_v30 }
 0x12b   :  { %945 = vst [vmem:[%s1423_s3 + $0x90] sm:$0xff] %v1045_v31  ;;  %v1047_v33 = vpack.c.bf16 %v753_v32, %v752_v29 }
 0x12d   :  { %947 = vst [vmem:[%s1423_s3 + $0x9c] sm:$0xff] %v1047_v33  ;;  %v443_v34 = vpop.f32.mrb[28].mxu0 }
 0x12e   :  { %v755_v35 = vadd.f32 %v1270_v38, %v443_v34  ;;  %v445_v36 = vpop.f32.mrb[29].mxu0 }
 0x12f   :  { %v756_v37 = vadd.f32 %v1272_v39, %v445_v36  ;;  %v447_v40 = vpop.f32.mrb[30].mxu0 }
 0x130   :  { %v758_v41 = vadd.f32 %v1270_v38, %v447_v40  ;;  %v449_v42 = vpop.f32.mrb[31].mxu0 }
 0x131   :  { %v1049_v43 = vpack.c.bf16 %v756_v37, %v755_v35  ;;  %v759_v44 = vadd.f32 %v1272_v39, %v449_v42 }
 0x133   :  { %949 = vst [vmem:[%s1423_s3 + $0xa8] sm:$0xff] %v1049_v43  ;;  %v1051_v45 = vpack.c.bf16 %v759_v44, %v758_v41 }
 0x135   :  { %951 = vst [vmem:[%s1423_s3 + $0xb4] sm:$0xff] %v1051_v45 }

// kernel: _lambda_.5
= control target key start
LH: loop header
LB: loop body
LE: loop exit
PB: predicated region body
PF: predicated region fallthrough
CT: control target
= control target key end

     0   :  { %v2130_v1 = vmov 0.0   ;;  %v2131_v2 = vmov 0   ;;  %vm2132_vm0 = vmmov 0   ;;  %v90_v29 = vlaneseq  ;;  %s3028_s3 = inlined_call_operand.vmem [shape: bf16[128,384], index: 3, kind: input, shape index: {}]   ;;  %s3029_s2 = inlined_call_operand.vmem [shape: f32[16,128], index: 2, kind: input, shape index: {}]   ;;  %s3030_s0 = inlined_call_operand.vmem [shape: bf16[8,16,384], index: 0, kind: input, shape index: {}]   ;;  %s3031_s4 = inlined_call_operand.vmem [shape: f32[1,384], index: 4, kind: input, shape index: {}]   ;;  %s3032_s1 = inlined_call_operand.vmem [shape: f32[16,384], index: 1, kind: input, shape index: {}]   ;;  %s3033_s5 = inlined_call_operand.vmem [shape: bf16[8,16,128], index: 5, kind: output, shape index: {0}]   ;;  %s3034_s6 = inlined_call_operand.vmem [shape: f32[16,128], index: 6, kind: output, shape index: {1}]  }
   0x1   :  { %v2171_v0 = vld [vmem:[%s3028_s3 + $0x4] ss:$12 sps:$4 sm:$0xff]   ;;  %1745 = vmatprep.subr.bf16.mxu1 %v2130_v1  ;;  %265 = vmatprep.mubr.bf16.mxu0 %v2131_v2  ;;  %v2178_v3 = vld [vmem:[%s3028_s3] ss:$12 sps:$4 sm:$0xff]   ;;  %v2186_v4 = vld [vmem:[%s3028_s3 + $0x1c] ss:$12 sps:$4 sm:$0xff]  }
   0x2   :  { %1761 = vmatprep.mubr.msk.bf16.mxu1 %vm2132_vm0, %v2130_v1  ;;  %233 = vmatprep.subr.bf16.mxu0 %v2171_v0  ;;  %v2192_v5 = vld [vmem:[%s3028_s3 + $0x18] ss:$12 sps:$4 sm:$0xff]   ;;  %v2198_v6 = vld [vmem:[%s3028_s3 + $0x34] ss:$12 sps:$4 sm:$0xff]   ;;  %v2204_v7 = vld [vmem:[%s3028_s3 + $0x30] ss:$12 sps:$4 sm:$0xff]  }
   0x3   :  { %234 = vmatpush1.bf16.msra.mxu0 %v2178_v3  ;;  %v2210_v8 = vld [vmem:[%s3028_s3 + $0x4c] ss:$12 sps:$4 sm:$0xff]   ;;  %v2215_v9 = vld [vmem:[%s3028_s3 + $0x8] ss:$12 sps:$4 sm:$0xff]   ;;  %v2227_v11 = vld [vmem:[%s3028_s3 + $0x64] ss:$12 sps:$4 sm:$0xff]  }
   0x4   :  { %235 = vmatprep.subr.bf16.mxu0 %v2186_v4  ;;  %v2221_v10 = vld [vmem:[%s3028_s3 + $0x48] ss:$12 sps:$4 sm:$0xff]   ;;  %1746 = vmatpush3.bf16.msra.mxu1 %v2215_v9  ;;  %v2233_v12 = vld [vmem:[%s3028_s3 + $0x20] ss:$12 sps:$4 sm:$0xff]   ;;  %v2252_v15 = vld [vmem:[%s3028_s3 + $0x38] ss:$12 sps:$4 sm:$0xff]  }
   0x5   :  { %1747 = vmatprep.subr.bf16.mxu1 %v2130_v1  ;;  %v2239_v13 = vld [vmem:[%s3028_s3 + $0x60] ss:$12 sps:$4 sm:$0xff]   ;;  %v2245_v14 = vld [vmem:[%s3028_s3 + $0x7c] ss:$12 sps:$4 sm:$0xff]   ;;  %v2259_v16 = vld [vmem:[%s3028_s3 + $0x78] ss:$12 sps:$4 sm:$0xff]  }
   0x6   :  { %v2265_v17 = vld [vmem:[%s3028_s3 + $0x94] ss:$12 sps:$4 sm:$0xff]   ;;  %v2271_v18 = vld [vmem:[%s3028_s3 + $0x50] ss:$12 sps:$4 sm:$0xff]   ;;  %v2284_v20 = vld [vmem:[%s3028_s3 + $0xac] ss:$12 sps:$4 sm:$0xff]  }
   0x7   :  { %236 = vmatpush1.bf16.msra.mxu0 %v2192_v5  ;;  %v2278_v19 = vld [vmem:[%s3028_s3 + $0x90] ss:$12 sps:$4 sm:$0xff]   ;;  %v2290_v21 = vld [vmem:[%s3028_s3 + $0x68] ss:$12 sps:$4 sm:$0xff]   ;;  %v2302_v23 = vld [vmem:[%s3029_s2] sm:$0xff]  ;;  %v91_v30 = vshrl.u32 %v90_v29, 7 }
   0x8   :  { %237 = vmatprep.subr.bf16.mxu0 %v2198_v6  ;;  %1748 = vmatpush3.bf16.msra.mxu1 %v2233_v12  ;;  %v2297_v22 = vld [vmem:[%s3028_s3 + $0xa8] ss:$12 sps:$4 sm:$0xff]   ;;  %v2314_v25 = vld [vmem:[%s3028_s3 + $0x80] ss:$12 sps:$4 sm:$0xff]   ;;  %v2324_v27 = vld [vmem:[%s3028_s3 + $0x98] ss:$12 sps:$4 sm:$0xff]  }
   0x9   :  { %1749 = vmatprep.subr.bf16.mxu1 %v2130_v1  ;;  %v2307_v24 = vld [vmem:[%s3029_s2 + $0x8] sm:$0xff]  ;;  %v2334_v28 = vld [vmem:[%s3028_s3 + $0xb0] ss:$12 sps:$4 sm:$0xff]   ;;  %v72_v31 = vld [vmem:[%s3030_s0] sm:$0xff]  ;;  %v92_v32 = vsub.s32 0, %v91_v30  ;;  %v96_v34 = vsub.s32 1, %v91_v30 }
   0xa   :  { %v88_v26 = vpack.c.bf16 %v2307_v24, %v2302_v23  ;;  %v69_v33 = vld [vmem:[%s3031_s4] sm:$0x7]  ;;  %v74_v35 = vld [vmem:[%s3030_s0 + $0xc] sm:$0xff]  ;;  %v76_v36 = vunpack.c.l.bf16 %v72_v31  ;;  %v77_v40 = vunpack.c.h.bf16 %v72_v31  ;;  %v2393_v42 = vld [vmem:[%s3032_s1 + $0x18] sm:$0xff] }
   0xb   :  { %238 = vmatpush1.bf16.msra.mxu0 %v2204_v7  ;;  %v2384_v37 = vld [vmem:[%s3032_s1] sm:$0xff]  ;;  %v2386_v38 = vrot.slane %v69_v33, %v92_v32  ;;  %v79_v39 = vunpack.c.l.bf16 %v74_v35  ;;  %v2388_v41 = vrot.slane %v69_v33, %v96_v34  ;;  %v2399_v44 = vld [vmem:[%s3032_s1 + $0x8] sm:$0xff]  ;;  %v80_v46 = vunpack.c.h.bf16 %v74_v35 }
   0xc   :  { %239 = vmatprep.subr.bf16.mxu0 %v2210_v8  ;;  %1750 = vmatpush3.bf16.msra.mxu1 %v2252_v15  ;;  %v82_v43 = vadd.f32 %v76_v36, %v2384_v37  ;;  %v2406_v50 = vld [vmem:[%s3032_s1 + $0x20] sm:$0xff]  ;;  %v83_v51 = vadd.f32 %v77_v40, %v2399_v44 }
   0xd   :  { %1751 = vmatprep.subr.bf16.mxu1 %v2130_v1  ;;  %v85_v49 = vadd.f32 %v79_v39, %v2393_v42  ;;  %v86_v57 = vadd.f32 %v80_v46, %v2406_v50  ;;  %v73_v46 = vld [vmem:[%s3030_s0 + $0x8] ss:$12 sps:$4 sm:$0xff]  }
   0xf   :  { %240 = vmatpush1.bf16.msra.mxu0 %v2221_v10 }
  0x10   :  { %241 = vmatprep.subr.bf16.mxu0 %v2227_v11  ;;  %1752 = vmatpush3.bf16.msra.mxu1 %v2271_v18 }
  0x11   :  { %1753 = vmatprep.subr.bf16.mxu1 %v2130_v1 }
  0x13   :  { %242 = vmatpush1.bf16.msra.mxu0 %v2239_v13 }
  0x14   :  { %243 = vmatprep.subr.bf16.mxu0 %v2245_v14  ;;  %1754 = vmatpush3.bf16.msra.mxu1 %v2290_v21 }
  0x15   :  { %1755 = vmatprep.subr.bf16.mxu1 %v2130_v1 }
  0x17   :  { %244 = vmatpush1.bf16.msra.mxu0 %v2259_v16 }
  0x18   :  { %245 = vmatprep.subr.bf16.mxu0 %v2265_v17  ;;  %1756 = vmatpush3.bf16.msra.mxu1 %v2314_v25 }
  0x19   :  { %1757 = vmatprep.subr.bf16.mxu1 %v2130_v1 }
  0x1b   :  { %246 = vmatpush1.bf16.msra.mxu0 %v2278_v19 }
  0x1c   :  { %247 = vmatprep.subr.bf16.mxu0 %v2284_v20  ;;  %1758 = vmatpush3.bf16.msra.mxu1 %v2324_v27 }
  0x1d   :  { %1759 = vmatprep.subr.bf16.mxu1 %v2130_v1 }
  0x1f   :  { %248 = vmatpush1.bf16.msra.mxu0 %v2297_v22 }
  0x20   :  { %391 = vmatprep.subr.bf16.mxu0 %v2171_v0  ;;  %1760 = vmatpush3.bf16.msra.mxu1 %v2334_v28 }
  0x21   :  { %1765 = vmatprep.subr.bf16.mxu1 %v2130_v1 }
  0x22   :  { %266 = vmatmul.mubr.bf16.vlgmr.msra.gmra.mrb[0].mxu0 %v88_v26 }
  0x23   :  { %392 = vmatpush1.bf16.msra.mxu0 %v2178_v3  ;;  %423 = vmatprep.mubr.bf16.mxu0 %v2131_v2 }
  0x24   :  { %393 = vmatprep.subr.bf16.mxu0 %v2186_v4  ;;  %1762 = vmatmul.mubr.bf16.vlgmr.msra.gmra.mrb[0].mxu1 %v88_v26 }
  0x25   :  { %1766 = vmatpush3.bf16.msra.mxu1 %v2215_v9  ;;  %1781 = vmatprep.mubr.msk.bf16.mxu1 %vm2132_vm0, %v2130_v1 }
  0x26   :  { %1767 = vmatprep.subr.bf16.mxu1 %v2130_v1 }
  0x27   :  { %394 = vmatpush1.bf16.msra.mxu0 %v2192_v5 }
  0x28   :  { %395 = vmatprep.subr.bf16.mxu0 %v2198_v6 }
  0x29   :  { %1768 = vmatpush3.bf16.msra.mxu1 %v2233_v12 }
  0x2a   :  { %1769 = vmatprep.subr.bf16.mxu1 %v2130_v1 }
  0x2b   :  { %396 = vmatpush1.bf16.msra.mxu0 %v2204_v7 }
  0x2c   :  { %397 = vmatprep.subr.bf16.mxu0 %v2210_v8 }
  0x2d   :  { %1770 = vmatpush3.bf16.msra.mxu1 %v2252_v15 }
  0x2e   :  { %1771 = vmatprep.subr.bf16.mxu1 %v2130_v1 }
  0x2f   :  { %398 = vmatpush1.bf16.msra.mxu0 %v2221_v10 }
  0x30   :  { %399 = vmatprep.subr.bf16.mxu0 %v2227_v11 }
  0x31   :  { %1772 = vmatpush3.bf16.msra.mxu1 %v2271_v18 }
  0x32   :  { %1773 = vmatprep.subr.bf16.mxu1 %v2130_v1 }
  0x33   :  { %400 = vmatpush1.bf16.msra.mxu0 %v2239_v13 }
  0x34   :  { %401 = vmatprep.subr.bf16.mxu0 %v2245_v14 }
  0x35   :  { %1774 = vmatpush3.bf16.msra.mxu1 %v2290_v21 }
  0x36   :  { %1775 = vmatprep.subr.bf16.mxu1 %v2130_v1 }
  0x37   :  { %402 = vmatpush1.bf16.msra.mxu0 %v2259_v16 }
  0x38   :  { %403 = vmatprep.subr.bf16.mxu0 %v2265_v17 }
  0x39   :  { %1776 = vmatpush3.bf16.msra.mxu1 %v2314_v25 }
  0x3a   :  { %1777 = vmatprep.subr.bf16.mxu1 %v2130_v1 }
  0x3b   :  { %404 = vmatpush1.bf16.msra.mxu0 %v2278_v19 }
  0x3c   :  { %405 = vmatprep.subr.bf16.mxu0 %v2284_v20 }
  0x3d   :  { %1778 = vmatpush3.bf16.msra.mxu1 %v2324_v27 }
  0x3e   :  { %1779 = vmatprep.subr.bf16.mxu1 %v2130_v1 }
  0x3f   :  { %406 = vmatpush1.bf16.msra.mxu0 %v2297_v22 }
  0x40   :  { %550 = vmatprep.subr.bf16.mxu0 %v2171_v0 }
  0x41   :  { %1780 = vmatpush3.bf16.msra.mxu1 %v2334_v28 }
  0x42   :  { %1785 = vmatprep.subr.bf16.mxu1 %v2130_v1 }
  0xf5   :  { %v267_v45 = vpop.f32.mrb[0].mxu0 }
  0xf6   :  { %v268_v47 = vadd.f32 %v267_v45, %v2386_v38  ;;  %v269_v48 = vpop.f32.mrb[1].mxu0 }
  0xf7   :  { %v270_v52 = vadd.f32 %v269_v48, %v2388_v41  ;;  %v271_v53 = vpop.f32.mrb[2].mxu0  ;;  %v310_v26 = vpop.f32.mrb[0].mxu1 }
  0xf8   :  { %v317_v54 = vadd.f32 %v268_v47, %v82_v43  ;;  %v272_v55 = vadd.f32 %v271_v53, %v2386_v38  ;;  %v273_v56 = vpop.f32.mrb[3].mxu0  ;;  %v1763_v31 = vpop.f32.mrb[1].mxu1  ;;  %v100_v43 = vsub.s32 2, %v91_v30 }
  0xf9   :  { %v274_v58 = vadd.f32 %v273_v56, %v2388_v41  ;;  %v331_v61 = vadd.f32 %v270_v52, %v83_v51  ;;  %v313_v32 = vpop.f32.mrb[2].mxu1  ;;  %v2421_v52 = vld [vmem:[%s3032_s1 + $0x10] sm:$0xff] }
  0xfa   :  { %v1520_v59 = vmul.f32 -1.442695, %v317_v54  ;;  %v318_v60 = vadd.f32 %v272_v55, %v85_v49  ;;  %v1764_v35 = vpop.f32.mrb[3].mxu1  ;;  %v2416_v47 = vrot.slane %v69_v33, %v100_v43  ;;  %v78_v49 = vunpack.c.l.bf16 %v73_v46  ;;  %v2427_v55 = vld [vmem:[%s3032_s1 + $0x28] sm:$0xff] }
  0xfb   :  { %v332_v63 = vadd.f32 %v274_v58, %v86_v57  ;;  %v1522_v29 = vmul.f32 -1.442695, %v331_v61  ;;  %v81_v54 = vunpack.c.h.bf16 %v73_v46 }
  0xfc   :  { %1940 = vpow2.f32 %v1520_v59  ;;  %v1521_v62 = vmul.f32 -1.442695, %v318_v60  ;;  %v311_v30 = vadd.f32 %v310_v26, %v2416_v47  ;;  %v84_v33 = vadd.f32 %v78_v49, %v2421_v52 }
  0xfd   :  { %v1523_v34 = vmul.f32 -1.442695, %v332_v63  ;;  %v87_v59 = vadd.f32 %v81_v54, %v2427_v55  ;;  %v314_v60 = vadd.f32 %v313_v32, %v2416_v47 }
  0xfe   :  { %1942 = vpow2.f32 %v1521_v62 }
  0xff   :  { %1944 = vpow2.f32 %v1522_v29 }
 0x100   :  { %1946 = vpow2.f32 %v1523_v34 }
 0x106   :  { %v1941_v36 = vpop.eup %1940 }
 0x107   :  { %v325_v39 = vadd.f32 1.0, %v1941_v36 }
 0x108   :  { %v1943_v40 = vpop.eup %1942 }
 0x109   :  { %1948 = vrcp.f32 %v325_v39  ;;  %v326_v45 = vadd.f32 1.0, %v1943_v40  ;;  %v1945_v48 = vpop.eup %1944 }
 0x10a   :  { %v1947_v51 = vpop.eup %1946  ;;  %v339_v53 = vadd.f32 1.0, %v1945_v48 }
 0x10b   :  { %1950 = vrcp.f32 %v326_v45  ;;  %v340_v56 = vadd.f32 1.0, %v1947_v51 }
 0x10c   :  { %1952 = vrcp.f32 %v339_v53 }
 0x10d   :  { %1954 = vrcp.f32 %v340_v56 }
 0x113   :  { %v1949_v57 = vpop.eup %1948 }
 0x114   :  { %v345_v58 = vmul.f32 %v1949_v57, %v311_v30 }
 0x115   :  { %v1951_v61 = vpop.eup %1950 }
 0x116   :  { %v347_v62 = vadd.f32 %v345_v58, %v84_v33  ;;  %v346_v63 = vmul.f32 %v1951_v61, %v314_v60  ;;  %v1953_v29 = vpop.eup %1952 }
 0x117   :  { %v1955_v31 = vpop.eup %1954  ;;  %v351_v34 = vsub.f32 1.0, %v1953_v29  ;;  %v355_v40 = vmul.f32 %v1953_v29, %v2302_v23  ;;  %v1526_v23 = vld [vmem:[%s3030_s0 + $0x18] sm:$0xff] }
 0x118   :  { %1956 = vtanh.f32 %v347_v62  ;;  %v348_v26 = vadd.f32 %v346_v63, %v87_v59  ;;  %v352_v36 = vsub.f32 1.0, %v1955_v31  ;;  %v356_v46 = vmul.f32 %v1955_v31, %v2307_v24  ;;  %v1528_v24 = vld [vmem:[%s3030_s0 + $0x24] sm:$0xff] }
 0x119   :  { %v378_v51 = vunpack.c.l.bf16 %v1526_v23  ;;  %v381_v53 = vunpack.c.l.bf16 %v1528_v24  ;;  %v379_v30 = vunpack.c.h.bf16 %v1526_v23  ;;  %v382_v57 = vunpack.c.h.bf16 %v1528_v24 }
 0x11a   :  { %1958 = vtanh.f32 %v348_v26 }
 0x11b   :  { %v384_v54 = vadd.f32 %v378_v51, %v2384_v37  ;;  %v387_v61 = vadd.f32 %v381_v53, %v2393_v42  ;;  %v385_v62 = vadd.f32 %v379_v30, %v2399_v44 }
 0x122   :  { %v1957_v35 = vpop.eup %1956 }
 0x123   :  { %v353_v39 = vmul.f32 %v1957_v35, %v351_v34 }
 0x124   :  { %v1959_v43 = vpop.eup %1958 }
 0x125   :  { %v354_v45 = vmul.f32 %v1959_v43, %v352_v36  ;;  %v2434_v32 = vadd.f32 %v355_v40, %v353_v39  ;;  %v388_v39 = vadd.f32 %v382_v57, %v2406_v50  ;;  %v1527_v57 = vld [vmem:[%s3030_s0 + $0x20] ss:$12 sps:$4 sm:$0xff]  }
 0x127   :  { %v2436_v48 = vadd.f32 %v356_v46, %v354_v45 }
 0x129   :  { %v1629_v49 = vpack.c.bf16 %v2436_v48, %v2434_v32 }
 0x12b   :  { %1630 = vst [vmem:[%s3033_s5] sm:$0xff] %v1629_v49   ;;  %424 = vmatmul.mubr.bf16.vlgmr.msra.gmra.mrb[4].mxu0 %v1629_v49  ;;  %1782 = vmatmul.mubr.bf16.vlgmr.msra.gmra.mrb[4].mxu1 %v1629_v49 }
 0x12c   :  { %551 = vmatpush1.bf16.msra.mxu0 %v2178_v3  ;;  %1786 = vmatpush3.bf16.msra.mxu1 %v2215_v9 }
 0x12d   :  { %552 = vmatprep.subr.bf16.mxu0 %v2186_v4  ;;  %1787 = vmatprep.subr.bf16.mxu1 %v2130_v1 }
 0x12e   :  { %582 = vmatprep.mubr.bf16.mxu0 %v2131_v2  ;;  %1801 = vmatprep.mubr.msk.bf16.mxu1 %vm2132_vm0, %v2130_v1 }
 0x130   :  { %553 = vmatpush1.bf16.msra.mxu0 %v2192_v5  ;;  %1788 = vmatpush3.bf16.msra.mxu1 %v2233_v12 }
 0x131   :  { %554 = vmatprep.subr.bf16.mxu0 %v2198_v6  ;;  %1789 = vmatprep.subr.bf16.mxu1 %v2130_v1 }
 0x134   :  { %555 = vmatpush1.bf16.msra.mxu0 %v2204_v7  ;;  %1790 = vmatpush3.bf16.msra.mxu1 %v2252_v15 }
 0x135   :  { %556 = vmatprep.subr.bf16.mxu0 %v2210_v8  ;;  %1791 = vmatprep.subr.bf16.mxu1 %v2130_v1 }
 0x138   :  { %557 = vmatpush1.bf16.msra.mxu0 %v2221_v10  ;;  %1792 = vmatpush3.bf16.msra.mxu1 %v2271_v18 }
 0x139   :  { %558 = vmatprep.subr.bf16.mxu0 %v2227_v11  ;;  %1793 = vmatprep.subr.bf16.mxu1 %v2130_v1 }
 0x13c   :  { %559 = vmatpush1.bf16.msra.mxu0 %v2239_v13  ;;  %1794 = vmatpush3.bf16.msra.mxu1 %v2290_v21 }
 0x13d   :  { %560 = vmatprep.subr.bf16.mxu0 %v2245_v14  ;;  %1795 = vmatprep.subr.bf16.mxu1 %v2130_v1 }
 0x140   :  { %561 = vmatpush1.bf16.msra.mxu0 %v2259_v16  ;;  %1796 = vmatpush3.bf16.msra.mxu1 %v2314_v25 }
 0x141   :  { %562 = vmatprep.subr.bf16.mxu0 %v2265_v17  ;;  %1797 = vmatprep.subr.bf16.mxu1 %v2130_v1 }
 0x144   :  { %563 = vmatpush1.bf16.msra.mxu0 %v2278_v19  ;;  %1798 = vmatpush3.bf16.msra.mxu1 %v2324_v27 }
 0x145   :  { %564 = vmatprep.subr.bf16.mxu0 %v2284_v20  ;;  %1799 = vmatprep.subr.bf16.mxu1 %v2130_v1 }
 0x148   :  { %565 = vmatpush1.bf16.msra.mxu0 %v2297_v22  ;;  %1800 = vmatpush3.bf16.msra.mxu1 %v2334_v28 }
 0x149   :  { %709 = vmatprep.subr.bf16.mxu0 %v2171_v0  ;;  %1805 = vmatprep.subr.bf16.mxu1 %v2130_v1 }
 0x1fe   :  { %v425_v56 = vpop.f32.mrb[4].mxu0  ;;  %v468_v33 = vpop.f32.mrb[4].mxu1 }
 0x1ff   :  { %v426_v58 = vadd.f32 %v425_v56, %v2386_v38  ;;  %v427_v59 = vpop.f32.mrb[5].mxu0  ;;  %v1783_v60 = vpop.f32.mrb[5].mxu1 }
 0x200   :  { %v428_v63 = vadd.f32 %v427_v59, %v2388_v41  ;;  %v429_v26 = vpop.f32.mrb[6].mxu0  ;;  %v471_v29 = vpop.f32.mrb[6].mxu1  ;;  %v380_v59 = vunpack.c.l.bf16 %v1527_v57 }
 0x201   :  { %v475_v31 = vadd.f32 %v426_v58, %v384_v54  ;;  %v430_v34 = vadd.f32 %v429_v26, %v2386_v38  ;;  %v431_v35 = vpop.f32.mrb[7].mxu0  ;;  %v1784_v36 = vpop.f32.mrb[7].mxu1  ;;  %v469_v26 = vadd.f32 %v468_v33, %v2416_v47 }
 0x202   :  { %v432_v40 = vadd.f32 %v431_v35, %v2388_v41  ;;  %v489_v46 = vadd.f32 %v428_v63, %v385_v62  ;;  %v383_v62 = vunpack.c.h.bf16 %v1527_v57  ;;  %v386_v63 = vadd.f32 %v380_v59, %v2421_v52 }
 0x203   :  { %v1530_v43 = vmul.f32 -1.442695, %v475_v31  ;;  %v476_v45 = vadd.f32 %v430_v34, %v387_v61 }
 0x204   :  { %v490_v23 = vadd.f32 %v432_v40, %v388_v39  ;;  %v1532_v24 = vmul.f32 -1.442695, %v489_v46  ;;  %v389_v36 = vadd.f32 %v383_v62, %v2427_v55  ;;  %v472_v39 = vadd.f32 %v471_v29, %v2416_v47 }
 0x205   :  { %1960 = vpow2.f32 %v1530_v43  ;;  %v1531_v49 = vmul.f32 -1.442695, %v476_v45 }
 0x206   :  { %v1533_v51 = vmul.f32 -1.442695, %v490_v23 }
 0x207   :  { %1962 = vpow2.f32 %v1531_v49 }
 0x208   :  { %1964 = vpow2.f32 %v1532_v24 }
 0x209   :  { %1966 = vpow2.f32 %v1533_v51 }
 0x20f   :  { %v1961_v53 = vpop.eup %1960 }
 0x210   :  { %v483_v30 = vadd.f32 1.0, %v1961_v53 }
 0x211   :  { %v1963_v54 = vpop.eup %1962 }
 0x212   :  { %1968 = vrcp.f32 %v483_v30  ;;  %v484_v56 = vadd.f32 1.0, %v1963_v54  ;;  %v1965_v58 = vpop.eup %1964 }
 0x213   :  { %v1967_v60 = vpop.eup %1966  ;;  %v497_v61 = vadd.f32 1.0, %v1965_v58 }
 0x214   :  { %1970 = vrcp.f32 %v484_v56  ;;  %v498_v31 = vadd.f32 1.0, %v1967_v60 }
 0x215   :  { %1972 = vrcp.f32 %v497_v61 }
 0x216   :  { %1974 = vrcp.f32 %v498_v31 }
 0x21c   :  { %v1969_v34 = vpop.eup %1968 }
 0x21d   :  { %v503_v35 = vmul.f32 %v1969_v34, %v469_v26 }
 0x21e   :  { %v1971_v40 = vpop.eup %1970 }
 0x21f   :  { %v505_v43 = vadd.f32 %v503_v35, %v386_v63  ;;  %v504_v45 = vmul.f32 %v1971_v40, %v472_v39  ;;  %v1973_v49 = vpop.eup %1972 }
 0x220   :  { %v1975_v23 = vpop.eup %1974  ;;  %v509_v24 = vsub.f32 1.0, %v1973_v49  ;;  %v513_v30 = vmul.f32 %v1973_v49, %v2434_v32  ;;  %v1538_v32 = vld [vmem:[%s3030_s0 + $0x30] sm:$0xff] }
 0x221   :  { %1976 = vtanh.f32 %v505_v43  ;;  %v506_v46 = vadd.f32 %v504_v45, %v389_v36  ;;  %v510_v33 = vsub.f32 1.0, %v1975_v23  ;;  %v514_v57 = vmul.f32 %v1975_v23, %v2436_v48  ;;  %v1540_v48 = vld [vmem:[%s3030_s0 + $0x3c] sm:$0xff] }
 0x222   :  { %v537_v60 = vunpack.c.l.bf16 %v1538_v32  ;;  %v540_v61 = vunpack.c.l.bf16 %v1540_v48  ;;  %v538_v62 = vunpack.c.h.bf16 %v1538_v32  ;;  %v541_v34 = vunpack.c.h.bf16 %v1540_v48 }
 0x223   :  { %1978 = vtanh.f32 %v506_v46 }
 0x224   :  { %v543_v63 = vadd.f32 %v537_v60, %v2384_v37  ;;  %v546_v40 = vadd.f32 %v540_v61, %v2393_v42  ;;  %v544_v43 = vadd.f32 %v538_v62, %v2399_v44 }
 0x22b   :  { %v1977_v51 = vpop.eup %1976 }
 0x22c   :  { %v511_v53 = vmul.f32 %v1977_v51, %v509_v24 }
 0x22d   :  { %v1979_v54 = vpop.eup %1978 }
 0x22e   :  { %v512_v56 = vmul.f32 %v1979_v54, %v510_v33  ;;  %v2501_v29 = vadd.f32 %v513_v30, %v511_v53  ;;  %v547_v53 = vadd.f32 %v541_v34, %v2406_v50  ;;  %v1539_v34 = vld [vmem:[%s3030_s0 + $0x38] ss:$12 sps:$4 sm:$0xff]  }
 0x230   :  { %v2503_v58 = vadd.f32 %v514_v57, %v512_v56 }
 0x232   :  { %v1634_v59 = vpack.c.bf16 %v2503_v58, %v2501_v29 }
 0x234   :  { %1666 = vst [vmem:[%s3033_s5 + $0x8] sm:$0xff] %v1634_v59   ;;  %583 = vmatmul.mubr.bf16.vlgmr.msra.gmra.mrb[8].mxu0 %v1634_v59  ;;  %1802 = vmatmul.mubr.bf16.vlgmr.msra.gmra.mrb[8].mxu1 %v1634_v59 }
 0x235   :  { %710 = vmatpush1.bf16.msra.mxu0 %v2178_v3  ;;  %1806 = vmatpush3.bf16.msra.mxu1 %v2215_v9 }
 0x236   :  { %711 = vmatprep.subr.bf16.mxu0 %v2186_v4  ;;  %1807 = vmatprep.subr.bf16.mxu1 %v2130_v1 }
 0x237   :  { %741 = vmatprep.mubr.bf16.mxu0 %v2131_v2  ;;  %1821 = vmatprep.mubr.msk.bf16.mxu1 %vm2132_vm0, %v2130_v1 }
 0x239   :  { %712 = vmatpush1.bf16.msra.mxu0 %v2192_v5  ;;  %1808 = vmatpush3.bf16.msra.mxu1 %v2233_v12 }
 0x23a   :  { %713 = vmatprep.subr.bf16.mxu0 %v2198_v6  ;;  %1809 = vmatprep.subr.bf16.mxu1 %v2130_v1 }
 0x23d   :  { %714 = vmatpush1.bf16.msra.mxu0 %v2204_v7  ;;  %1810 = vmatpush3.bf16.msra.mxu1 %v2252_v15 }
 0x23e   :  { %715 = vmatprep.subr.bf16.mxu0 %v2210_v8  ;;  %1811 = vmatprep.subr.bf16.mxu1 %v2130_v1 }
 0x241   :  { %716 = vmatpush1.bf16.msra.mxu0 %v2221_v10  ;;  %1812 = vmatpush3.bf16.msra.mxu1 %v2271_v18 }
 0x242   :  { %717 = vmatprep.subr.bf16.mxu0 %v2227_v11  ;;  %1813 = vmatprep.subr.bf16.mxu1 %v2130_v1 }
 0x245   :  { %718 = vmatpush1.bf16.msra.mxu0 %v2239_v13  ;;  %1814 = vmatpush3.bf16.msra.mxu1 %v2290_v21 }
 0x246   :  { %719 = vmatprep.subr.bf16.mxu0 %v2245_v14  ;;  %1815 = vmatprep.subr.bf16.mxu1 %v2130_v1 }
 0x249   :  { %720 = vmatpush1.bf16.msra.mxu0 %v2259_v16  ;;  %1816 = vmatpush3.bf16.msra.mxu1 %v2314_v25 }
 0x24a   :  { %721 = vmatprep.subr.bf16.mxu0 %v2265_v17  ;;  %1817 = vmatprep.subr.bf16.mxu1 %v2130_v1 }
 0x24d   :  { %722 = vmatpush1.bf16.msra.mxu0 %v2278_v19  ;;  %1818 = vmatpush3.bf16.msra.mxu1 %v2324_v27 }
 0x24e   :  { %723 = vmatprep.subr.bf16.mxu0 %v2284_v20  ;;  %1819 = vmatprep.subr.bf16.mxu1 %v2130_v1 }
 0x251   :  { %724 = vmatpush1.bf16.msra.mxu0 %v2297_v22  ;;  %1820 = vmatpush3.bf16.msra.mxu1 %v2334_v28 }
 0x252   :  { %868 = vmatprep.subr.bf16.mxu0 %v2171_v0  ;;  %1825 = vmatprep.subr.bf16.mxu1 %v2130_v1 }
 0x307   :  { %v584_v26 = vpop.f32.mrb[8].mxu0  ;;  %v627_v31 = vpop.f32.mrb[8].mxu1 }
 0x308   :  { %v585_v35 = vadd.f32 %v584_v26, %v2386_v38  ;;  %v586_v36 = vpop.f32.mrb[9].mxu0  ;;  %v1803_v39 = vpop.f32.mrb[9].mxu1 }
 0x309   :  { %v587_v45 = vadd.f32 %v586_v36, %v2388_v41  ;;  %v588_v46 = vpop.f32.mrb[10].mxu0  ;;  %v630_v49 = vpop.f32.mrb[10].mxu1  ;;  %v539_v36 = vunpack.c.l.bf16 %v1539_v34 }
 0x30a   :  { %v634_v23 = vadd.f32 %v585_v35, %v543_v63  ;;  %v589_v24 = vadd.f32 %v588_v46, %v2386_v38  ;;  %v590_v51 = vpop.f32.mrb[11].mxu0  ;;  %v1804_v33 = vpop.f32.mrb[11].mxu1  ;;  %v628_v46 = vadd.f32 %v627_v31, %v2416_v47 }
 0x30b   :  { %v591_v30 = vadd.f32 %v590_v51, %v2388_v41  ;;  %v648_v57 = vadd.f32 %v587_v45, %v544_v43  ;;  %v542_v43 = vunpack.c.h.bf16 %v1539_v34  ;;  %v545_v45 = vadd.f32 %v539_v36, %v2421_v52 }
 0x30c   :  { %v1542_v54 = vmul.f32 -1.442695, %v634_v23  ;;  %v635_v56 = vadd.f32 %v589_v24, %v546_v40 }
 0x30d   :  { %v649_v32 = vadd.f32 %v591_v30, %v547_v53  ;;  %v1544_v48 = vmul.f32 -1.442695, %v648_v57  ;;  %v548_v33 = vadd.f32 %v542_v43, %v2427_v55  ;;  %v631_v53 = vadd.f32 %v630_v49, %v2416_v47 }
 0x30e   :  { %1980 = vpow2.f32 %v1542_v54  ;;  %v1543_v59 = vmul.f32 -1.442695, %v635_v56 }
 0x30f   :  { %v1545_v60 = vmul.f32 -1.442695, %v649_v32 }
 0x310   :  { %1982 = vpow2.f32 %v1543_v59 }
 0x311   :  { %1984 = vpow2.f32 %v1544_v48 }
 0x312   :  { %1986 = vpow2.f32 %v1545_v60 }
 0x318   :  { %v1981_v61 = vpop.eup %1980 }
 0x319   :  { %v642_v62 = vadd.f32 1.0, %v1981_v61 }
 0x31a   :  { %v1983_v63 = vpop.eup %1982 }
 0x31b   :  { %1988 = vrcp.f32 %v642_v62  ;;  %v643_v26 = vadd.f32 1.0, %v1983_v63  ;;  %v1985_v35 = vpop.eup %1984 }
 0x31c   :  { %v1987_v39 = vpop.eup %1986  ;;  %v656_v40 = vadd.f32 1.0, %v1985_v35 }
 0x31d   :  { %1990 = vrcp.f32 %v643_v26  ;;  %v657_v23 = vadd.f32 1.0, %v1987_v39 }
 0x31e   :  { %1992 = vrcp.f32 %v656_v40 }
 0x31f   :  { %1994 = vrcp.f32 %v657_v23 }
 0x325   :  { %v1989_v24 = vpop.eup %1988 }
 0x326   :  { %v662_v51 = vmul.f32 %v1989_v24, %v628_v46 }
 0x327   :  { %v1991_v30 = vpop.eup %1990 }
 0x328   :  { %v664_v54 = vadd.f32 %v662_v51, %v545_v45  ;;  %v663_v56 = vmul.f32 %v1991_v30, %v631_v53  ;;  %v1993_v59 = vpop.eup %1992 }
 0x329   :  { %v1995_v32 = vpop.eup %1994  ;;  %v668_v48 = vsub.f32 1.0, %v1993_v59  ;;  %v672_v62 = vmul.f32 %v1993_v59, %v2501_v29 }
 0x32a   :  { %1996 = vtanh.f32 %v664_v54  ;;  %v665_v57 = vadd.f32 %v663_v56, %v548_v33  ;;  %v669_v31 = vsub.f32 1.0, %v1995_v32  ;;  %v673_v34 = vmul.f32 %v1995_v32, %v2503_v58 }
 0x32c   :  { %1998 = vtanh.f32 %v665_v57  ;;  %v1551_v57 = vld [vmem:[%s3030_s0 + $0x50] ss:$12 sps:$4 sm:$0xff]  }
 0x32d   :  { %v698_v32 = vunpack.c.l.bf16 %v1551_v57 }
 0x334   :  { %v1997_v60 = vpop.eup %1996 }
 0x335   :  { %v670_v61 = vmul.f32 %v1997_v60, %v668_v48 }
 0x336   :  { %v1999_v63 = vpop.eup %1998 }
 0x337   :  { %v671_v26 = vmul.f32 %v1999_v63, %v669_v31  ;;  %v2568_v49 = vadd.f32 %v672_v62, %v670_v61  ;;  %v701_v31 = vunpack.c.h.bf16 %v1551_v57  ;;  %v704_v61 = vadd.f32 %v698_v32, %v2421_v52 }
 0x339   :  { %v2570_v35 = vadd.f32 %v673_v34, %v671_v26 }
 0x33b   :  { %v1639_v36 = vpack.c.bf16 %v2570_v35, %v2568_v49 }
 0x33d   :  { %1667 = vst [vmem:[%s3033_s5 + $0x10] sm:$0xff] %v1639_v36   ;;  %742 = vmatmul.mubr.bf16.vlgmr.msra.gmra.mrb[12].mxu0 %v1639_v36  ;;  %1822 = vmatmul.mubr.bf16.vlgmr.msra.gmra.mrb[12].mxu1 %v1639_v36  ;;  %v707_v36 = vadd.f32 %v701_v31, %v2427_v55 }
 0x33e   :  { %869 = vmatpush1.bf16.msra.mxu0 %v2178_v3  ;;  %1826 = vmatpush3.bf16.msra.mxu1 %v2215_v9  ;;  %v1550_v3 = vld [vmem:[%s3030_s0 + $0x48] sm:$0xff] }
 0x33f   :  { %870 = vmatprep.subr.bf16.mxu0 %v2186_v4  ;;  %1827 = vmatprep.subr.bf16.mxu1 %v2130_v1  ;;  %v1552_v4 = vld [vmem:[%s3030_s0 + $0x54] sm:$0xff] }
 0x340   :  { %900 = vmatprep.mubr.bf16.mxu0 %v2131_v2  ;;  %1841 = vmatprep.mubr.msk.bf16.mxu1 %vm2132_vm0, %v2130_v1 }
 0x342   :  { %871 = vmatpush1.bf16.msra.mxu0 %v2192_v5  ;;  %1828 = vmatpush3.bf16.msra.mxu1 %v2233_v12  ;;  %v696_v5 = vunpack.c.l.bf16 %v1550_v3 }
 0x343   :  { %872 = vmatprep.subr.bf16.mxu0 %v2198_v6  ;;  %1829 = vmatprep.subr.bf16.mxu1 %v2130_v1  ;;  %v699_v6 = vunpack.c.l.bf16 %v1552_v4 }
 0x346   :  { %873 = vmatpush1.bf16.msra.mxu0 %v2204_v7  ;;  %1830 = vmatpush3.bf16.msra.mxu1 %v2252_v15  ;;  %v697_v7 = vunpack.c.h.bf16 %v1550_v3 }
 0x347   :  { %874 = vmatprep.subr.bf16.mxu0 %v2210_v8  ;;  %1831 = vmatprep.subr.bf16.mxu1 %v2130_v1  ;;  %v702_v8 = vadd.f32 %v696_v5, %v2384_v37 }
 0x348   :  { %v703_v15 = vadd.f32 %v697_v7, %v2399_v44 }
 0x34a   :  { %875 = vmatpush1.bf16.msra.mxu0 %v2221_v10  ;;  %1832 = vmatpush3.bf16.msra.mxu1 %v2271_v18 }
 0x34b   :  { %876 = vmatprep.subr.bf16.mxu0 %v2227_v11  ;;  %1833 = vmatprep.subr.bf16.mxu1 %v2130_v1  ;;  %v700_v11 = vunpack.c.h.bf16 %v1552_v4 }
 0x34d   :  { %v706_v39 = vadd.f32 %v700_v11, %v2406_v50 }
 0x34e   :  { %877 = vmatpush1.bf16.msra.mxu0 %v2239_v13  ;;  %1834 = vmatpush3.bf16.msra.mxu1 %v2290_v21 }
 0x34f   :  { %878 = vmatprep.subr.bf16.mxu0 %v2245_v14  ;;  %1835 = vmatprep.subr.bf16.mxu1 %v2130_v1  ;;  %v705_v14 = vadd.f32 %v699_v6, %v2393_v42 }
 0x352   :  { %879 = vmatpush1.bf16.msra.mxu0 %v2259_v16  ;;  %1836 = vmatpush3.bf16.msra.mxu1 %v2314_v25 }
 0x353   :  { %880 = vmatprep.subr.bf16.mxu0 %v2265_v17  ;;  %1837 = vmatprep.subr.bf16.mxu1 %v2130_v1 }
 0x356   :  { %881 = vmatpush1.bf16.msra.mxu0 %v2278_v19  ;;  %1838 = vmatpush3.bf16.msra.mxu1 %v2324_v27 }
 0x357   :  { %882 = vmatprep.subr.bf16.mxu0 %v2284_v20  ;;  %1839 = vmatprep.subr.bf16.mxu1 %v2130_v1 }
 0x35a   :  { %883 = vmatpush1.bf16.msra.mxu0 %v2297_v22  ;;  %1840 = vmatpush3.bf16.msra.mxu1 %v2334_v28 }
 0x35b   :  { %1027 = vmatprep.subr.bf16.mxu0 %v2171_v0  ;;  %1845 = vmatprep.subr.bf16.mxu1 %v2130_v1 }
 0x410   :  { %v743_v9 = vpop.f32.mrb[12].mxu0  ;;  %v786_v10 = vpop.f32.mrb[12].mxu1 }
 0x411   :  { %v744_v0 = vadd.f32 %v743_v9, %v2386_v38  ;;  %v745_v12 = vpop.f32.mrb[13].mxu0  ;;  %v1823_v13 = vpop.f32.mrb[13].mxu1  ;;  %v787_v62 = vadd.f32 %v786_v10, %v2416_v47 }
 0x412   :  { %v746_v16 = vadd.f32 %v745_v12, %v2388_v41  ;;  %v747_v17 = vpop.f32.mrb[14].mxu0  ;;  %v789_v19 = vpop.f32.mrb[14].mxu1 }
 0x413   :  { %v793_v20 = vadd.f32 %v744_v0, %v702_v8  ;;  %v748_v22 = vadd.f32 %v747_v17, %v2386_v38  ;;  %v749_v29 = vpop.f32.mrb[15].mxu0  ;;  %v1824_v58 = vpop.f32.mrb[15].mxu1  ;;  %v790_v3 = vadd.f32 %v789_v19, %v2416_v47 }
 0x414   :  { %v750_v40 = vadd.f32 %v749_v29, %v2388_v41  ;;  %v807_v46 = vadd.f32 %v746_v16, %v703_v15  ;;  %v2669_v29 = vld [vmem:[%s3028_s3 + $0x18] ss:$12 sps:$4 sm:$0xff]   ;;  %v2675_v58 = vld [vmem:[%s3028_s3 + $0x20] ss:$12 sps:$4 sm:$0xff]  }
 0x415   :  { %v1554_v43 = vmul.f32 -1.442695, %v793_v20  ;;  %v794_v45 = vadd.f32 %v748_v22, %v705_v14  ;;  %v2659_v22 = vld [vmem:[%s3028_s3 + $0x1c] ss:$12 sps:$4 sm:$0xff]  }
 0x416   :  { %v808_v24 = vadd.f32 %v750_v40, %v706_v39  ;;  %v1556_v51 = vmul.f32 -1.442695, %v807_v46  ;;  %v2681_v39 = vld [vmem:[%s3028_s3 + $0x34] ss:$12 sps:$4 sm:$0xff]   ;;  %v2688_v40 = vld [vmem:[%s3028_s3 + $0x30] ss:$12 sps:$4 sm:$0xff]  }
 0x417   :  { %2000 = vpow2.f32 %v1554_v43  ;;  %v1555_v23 = vmul.f32 -1.442695, %v794_v45  ;;  %v2694_v43 = vld [vmem:[%s3028_s3 + $0x38] ss:$12 sps:$4 sm:$0xff]   ;;  %v2707_v46 = vld [vmem:[%s3028_s3 + $0x48] ss:$12 sps:$4 sm:$0xff]  }
 0x418   :  { %v1557_v33 = vmul.f32 -1.442695, %v808_v24  ;;  %v2700_v45 = vld [vmem:[%s3028_s3 + $0x4c] ss:$12 sps:$4 sm:$0xff]  }
 0x419   :  { %2002 = vpow2.f32 %v1555_v23  ;;  %v2714_v23 = vld [vmem:[%s3028_s3 + $0x64] ss:$12 sps:$4 sm:$0xff]   ;;  %v2721_v24 = vld [vmem:[%s3028_s3 + $0x60] ss:$12 sps:$4 sm:$0xff]  }
 0x41a   :  { %2004 = vpow2.f32 %v1556_v51  ;;  %v2735_v51 = vld [vmem:[%s3028_s3 + $0x78] ss:$12 sps:$4 sm:$0xff]  }
 0x41b   :  { %2006 = vpow2.f32 %v1557_v33  ;;  %v2749_v33 = vld [vmem:[%s3028_s3 + $0x90] ss:$12 sps:$4 sm:$0xff]  }
 0x421   :  { %v2001_v53 = vpop.eup %2000 }
 0x422   :  { %v801_v30 = vadd.f32 1.0, %v2001_v53  ;;  %v2763_v53 = vld [vmem:[%s3028_s3 + $0xa8] ss:$12 sps:$4 sm:$0xff]  }
 0x423   :  { %v2003_v54 = vpop.eup %2002 }
 0x424   :  { %2008 = vrcp.f32 %v801_v30  ;;  %v802_v56 = vadd.f32 1.0, %v2003_v54  ;;  %v2005_v59 = vpop.eup %2004  ;;  %v1562_v30 = vld [vmem:[%s3030_s0 + $0x60] sm:$0xff]  ;;  %v1564_v54 = vld [vmem:[%s3030_s0 + $0x6c] sm:$0xff] }
 0x425   :  { %v2007_v48 = vpop.eup %2006  ;;  %v815_v60 = vadd.f32 1.0, %v2005_v59  ;;  %v858_v57 = vunpack.c.l.bf16 %v1564_v54 }
 0x426   :  { %2010 = vrcp.f32 %v802_v56  ;;  %v816_v63 = vadd.f32 1.0, %v2007_v48  ;;  %v855_v56 = vunpack.c.l.bf16 %v1562_v30 }
 0x427   :  { %2012 = vrcp.f32 %v815_v60  ;;  %v859_v60 = vunpack.c.h.bf16 %v1564_v54 }
 0x428   :  { %2014 = vrcp.f32 %v816_v63  ;;  %v861_v59 = vadd.f32 %v855_v56, %v2384_v37  ;;  %v864_v63 = vadd.f32 %v858_v57, %v2393_v42 }
 0x42e   :  { %v2009_v26 = vpop.eup %2008 }
 0x42f   :  { %v821_v34 = vmul.f32 %v2009_v26, %v787_v62 }
 0x430   :  { %v2011_v4 = vpop.eup %2010 }
 0x431   :  { %v823_v5 = vadd.f32 %v821_v34, %v704_v61  ;;  %v822_v6 = vmul.f32 %v2011_v4, %v790_v3  ;;  %v2013_v8 = vpop.eup %2012 }
 0x432   :  { %v2015_v9 = vpop.eup %2014  ;;  %v827_v11 = vsub.f32 1.0, %v2013_v8  ;;  %v831_v13 = vmul.f32 %v2013_v8, %v2568_v49  ;;  %v2647_v49 = vld [vmem:[%s3028_s3] ss:$12 sps:$4 sm:$0xff]  }
 0x433   :  { %2016 = vtanh.f32 %v823_v5  ;;  %v824_v7 = vadd.f32 %v822_v6, %v707_v36  ;;  %v828_v10 = vsub.f32 1.0, %v2015_v9  ;;  %v832_v16 = vmul.f32 %v2015_v9, %v2570_v35  ;;  %v2653_v35 = vld [vmem:[%s3028_s3 + $0x8] ss:$12 sps:$4 sm:$0xff]  }
 0x435   :  { %2018 = vtanh.f32 %v824_v7  ;;  %v865_v7 = vadd.f32 %v859_v60, %v2406_v50  ;;  %v1563_v50 = vld [vmem:[%s3030_s0 + $0x68] ss:$12 sps:$4 sm:$0xff]  }
 0x436   :  { %v860_v57 = vunpack.c.h.bf16 %v1563_v50 }
 0x43d   :  { %v2017_v0 = vpop.eup %2016 }
 0x43e   :  { %v829_v12 = vmul.f32 %v2017_v0, %v827_v11 }
 0x43f   :  { %v2019_v14 = vpop.eup %2018 }
 0x440   :  { %v830_v15 = vmul.f32 %v2019_v14, %v828_v10  ;;  %v2635_v17 = vadd.f32 %v831_v13, %v829_v12 }
 0x442   :  { %v2637_v19 = vadd.f32 %v832_v16, %v830_v15 }
 0x444   :  { %v1644_v20 = vpack.c.bf16 %v2637_v19, %v2635_v17 }
 0x446   :  { %1668 = vst [vmem:[%s3033_s5 + $0x18] sm:$0xff] %v1644_v20   ;;  %901 = vmatmul.mubr.bf16.vlgmr.msra.gmra.mrb[16].mxu0 %v1644_v20  ;;  %1842 = vmatmul.mubr.bf16.vlgmr.msra.gmra.mrb[16].mxu1 %v1644_v20 }
 0x447   :  { %1028 = vmatpush1.bf16.msra.mxu0 %v2647_v49  ;;  %1846 = vmatpush3.bf16.msra.mxu1 %v2653_v35 }
 0x448   :  { %1029 = vmatprep.subr.bf16.mxu0 %v2659_v22  ;;  %1847 = vmatprep.subr.bf16.mxu1 %v2130_v1 }
 0x449   :  { %1059 = vmatprep.mubr.bf16.mxu0 %v2131_v2  ;;  %1861 = vmatprep.mubr.msk.bf16.mxu1 %vm2132_vm0, %v2130_v1 }
 0x44b   :  { %1030 = vmatpush1.bf16.msra.mxu0 %v2669_v29  ;;  %1848 = vmatpush3.bf16.msra.mxu1 %v2675_v58 }
 0x44c   :  { %1031 = vmatprep.subr.bf16.mxu0 %v2681_v39  ;;  %1849 = vmatprep.subr.bf16.mxu1 %v2130_v1 }
 0x44f   :  { %1032 = vmatpush1.bf16.msra.mxu0 %v2688_v40  ;;  %1850 = vmatpush3.bf16.msra.mxu1 %v2694_v43 }
 0x450   :  { %1033 = vmatprep.subr.bf16.mxu0 %v2700_v45  ;;  %1851 = vmatprep.subr.bf16.mxu1 %v2130_v1 }
 0x453   :  { %1034 = vmatpush1.bf16.msra.mxu0 %v2707_v46  ;;  %1852 = vmatpush3.bf16.msra.mxu1 %v2271_v18  ;;  %v2728_v18 = vld [vmem:[%s3028_s3 + $0x7c] ss:$12 sps:$4 sm:$0xff]  }
 0x454   :  { %1035 = vmatprep.subr.bf16.mxu0 %v2714_v23  ;;  %1853 = vmatprep.subr.bf16.mxu1 %v2130_v1 }
 0x457   :  { %1036 = vmatpush1.bf16.msra.mxu0 %v2721_v24  ;;  %1854 = vmatpush3.bf16.msra.mxu1 %v2290_v21  ;;  %v2742_v21 = vld [vmem:[%s3028_s3 + $0x94] ss:$12 sps:$4 sm:$0xff]  }
 0x458   :  { %1037 = vmatprep.subr.bf16.mxu0 %v2728_v18  ;;  %1855 = vmatprep.subr.bf16.mxu1 %v2130_v1 }
 0x45b   :  { %1038 = vmatpush1.bf16.msra.mxu0 %v2735_v51  ;;  %1856 = vmatpush3.bf16.msra.mxu1 %v2314_v25  ;;  %v2756_v25 = vld [vmem:[%s3028_s3 + $0xac] ss:$12 sps:$4 sm:$0xff]  }
 0x45c   :  { %1039 = vmatprep.subr.bf16.mxu0 %v2742_v21  ;;  %1857 = vmatprep.subr.bf16.mxu1 %v2130_v1 }
 0x45f   :  { %1040 = vmatpush1.bf16.msra.mxu0 %v2749_v33  ;;  %1858 = vmatpush3.bf16.msra.mxu1 %v2324_v27  ;;  %v2770_v27 = vld [vmem:[%s3028_s3 + $0x4] ss:$12 sps:$4 sm:$0xff]  }
 0x460   :  { %1041 = vmatprep.subr.bf16.mxu0 %v2756_v25  ;;  %1859 = vmatprep.subr.bf16.mxu1 %v2130_v1 }
 0x463   :  { %1042 = vmatpush1.bf16.msra.mxu0 %v2763_v53  ;;  %1860 = vmatpush3.bf16.msra.mxu1 %v2334_v28  ;;  %v856_v28 = vunpack.c.h.bf16 %v1562_v30  ;;  %v857_v30 = vunpack.c.l.bf16 %v1563_v50  ;;  %v2875_v50 = vld [vmem:[%s3032_s1] sm:$0xff] }
 0x464   :  { %1186 = vmatprep.subr.bf16.mxu0 %v2770_v27  ;;  %1865 = vmatprep.subr.bf16.mxu1 %v2130_v1 }
 0x465   :  { %v862_v26 = vadd.f32 %v856_v28, %v2399_v44  ;;  %v863_v28 = vadd.f32 %v857_v30, %v2421_v52 }
 0x519   :  { %v902_v32 = vpop.f32.mrb[16].mxu0  ;;  %v945_v48 = vpop.f32.mrb[16].mxu1 }
 0x51a   :  { %v903_v31 = vadd.f32 %v902_v32, %v2386_v38  ;;  %v904_v61 = vpop.f32.mrb[17].mxu0  ;;  %v1843_v62 = vpop.f32.mrb[17].mxu1 }
 0x51b   :  { %v905_v34 = vadd.f32 %v904_v61, %v2388_v41  ;;  %v906_v36 = vpop.f32.mrb[18].mxu0  ;;  %v948_v3 = vpop.f32.mrb[18].mxu1  ;;  %v866_v61 = vadd.f32 %v860_v57, %v2427_v55 }
 0x51c   :  { %v952_v4 = vadd.f32 %v903_v31, %v861_v59  ;;  %v907_v5 = vadd.f32 %v906_v36, %v2386_v38  ;;  %v908_v6 = vpop.f32.mrb[19].mxu0  ;;  %v1844_v37 = vpop.f32.mrb[19].mxu1  ;;  %v946_v59 = vadd.f32 %v945_v48, %v2416_v47  ;;  %v949_v62 = vadd.f32 %v948_v3, %v2416_v47 }
 0x51d   :  { %v909_v8 = vadd.f32 %v908_v6, %v2388_v41  ;;  %v966_v0 = vadd.f32 %v905_v34, %v862_v26 }
 0x51e   :  { %v1566_v9 = vmul.f32 -1.442695, %v952_v4  ;;  %v953_v11 = vadd.f32 %v907_v5, %v864_v63 }
 0x51f   :  { %v967_v10 = vadd.f32 %v909_v8, %v865_v7  ;;  %v1568_v44 = vmul.f32 -1.442695, %v966_v0 }
 0x520   :  { %2020 = vpow2.f32 %v1566_v9  ;;  %v1567_v42 = vmul.f32 -1.442695, %v953_v11 }
 0x521   :  { %v1569_v12 = vmul.f32 -1.442695, %v967_v10  ;;  %v2852_v10 = vld [vmem:[%s3028_s3 + $0x98] ss:$12 sps:$4 sm:$0xff]  }
 0x522   :  { %2022 = vpow2.f32 %v1567_v42  ;;  %v2843_v42 = vld [vmem:[%s3028_s3 + $0x80] ss:$12 sps:$4 sm:$0xff]  }
 0x523   :  { %2024 = vpow2.f32 %v1568_v44  ;;  %v2861_v44 = vld [vmem:[%s3028_s3 + $0xb0] ss:$12 sps:$4 sm:$0xff]  }
 0x524   :  { %2026 = vpow2.f32 %v1569_v12  ;;  %v1574_v12 = vld [vmem:[%s3030_s0 + $0x78] sm:$0xff] }
 0x52a   :  { %v2021_v13 = vpop.eup %2020 }
 0x52b   :  { %v960_v14 = vadd.f32 1.0, %v2021_v13  ;;  %v1576_v13 = vld [vmem:[%s3030_s0 + $0x84] sm:$0xff] }
 0x52c   :  { %v2023_v15 = vpop.eup %2022 }
 0x52d   :  { %2028 = vrcp.f32 %v960_v14  ;;  %v961_v16 = vadd.f32 1.0, %v2023_v15  ;;  %v2025_v20 = vpop.eup %2024  ;;  %v1014_v14 = vunpack.c.l.bf16 %v1574_v12  ;;  %v1017_v15 = vunpack.c.l.bf16 %v1576_v13 }
 0x52e   :  { %v2027_v54 = vpop.eup %2026  ;;  %v974_v56 = vadd.f32 1.0, %v2025_v20 }
 0x52f   :  { %2030 = vrcp.f32 %v961_v16  ;;  %v975_v32 = vadd.f32 1.0, %v2027_v54  ;;  %v1015_v16 = vunpack.c.h.bf16 %v1574_v12  ;;  %v1018_v54 = vunpack.c.h.bf16 %v1576_v13 }
 0x530   :  { %2032 = vrcp.f32 %v974_v56 }
 0x531   :  { %2034 = vrcp.f32 %v975_v32 }
 0x537   :  { %v2029_v60 = vpop.eup %2028 }
 0x538   :  { %v980_v31 = vmul.f32 %v2029_v60, %v946_v59  ;;  %v2882_v59 = vld [vmem:[%s3032_s1 + $0x18] sm:$0xff]  ;;  %v2888_v60 = vld [vmem:[%s3032_s1 + $0x8] sm:$0xff] }
 0x539   :  { %v2031_v63 = vpop.eup %2030  ;;  %v1023_v32 = vadd.f32 %v2882_v59, %v1017_v15 }
 0x53a   :  { %v982_v26 = vadd.f32 %v980_v31, %v863_v28  ;;  %v981_v34 = vmul.f32 %v2031_v63, %v949_v62  ;;  %v2033_v4 = vpop.eup %2032  ;;  %v1021_v31 = vadd.f32 %v2888_v60, %v1015_v16  ;;  %v1575_v16 = vld [vmem:[%s3030_s0 + $0x80] ss:$12 sps:$4 sm:$0xff]  }
 0x53b   :  { %v2035_v5 = vpop.eup %2034  ;;  %v986_v52 = vsub.f32 1.0, %v2033_v4  ;;  %v990_v7 = vmul.f32 %v2033_v4, %v2635_v17  ;;  %v2825_v17 = vld [vmem:[%s3028_s3 + $0x50] ss:$12 sps:$4 sm:$0xff]  }
 0x53c   :  { %2036 = vtanh.f32 %v982_v26  ;;  %v983_v36 = vadd.f32 %v981_v34, %v866_v61  ;;  %v987_v48 = vsub.f32 1.0, %v2035_v5  ;;  %v991_v55 = vmul.f32 %v2035_v5, %v2637_v19  ;;  %v2834_v19 = vld [vmem:[%s3028_s3 + $0x68] ss:$12 sps:$4 sm:$0xff]   ;;  %v2896_v5 = vld [vmem:[%s3032_s1 + $0x20] sm:$0xff] }
 0x53e   :  { %2038 = vtanh.f32 %v983_v36 }
 0x546   :  { %v2037_v6 = vpop.eup %2036 }
 0x547   :  { %v988_v37 = vmul.f32 %v2037_v6, %v986_v52  ;;  %v1024_v52 = vadd.f32 %v2896_v5, %v1018_v54 }
 0x548   :  { %v2039_v8 = vpop.eup %2038 }
 0x549   :  { %v989_v9 = vmul.f32 %v2039_v8, %v987_v48  ;;  %v2797_v3 = vadd.f32 %v990_v7, %v988_v37 }
 0x54b   :  { %v2799_v11 = vadd.f32 %v991_v55, %v989_v9 }
 0x54d   :  { %v1649_v0 = vpack.c.bf16 %v2799_v11, %v2797_v3 }
 0x54f   :  { %1669 = vst [vmem:[%s3033_s5 + $0x20] sm:$0xff] %v1649_v0   ;;  %1060 = vmatmul.mubr.bf16.vlgmr.msra.gmra.mrb[20].mxu0 %v1649_v0  ;;  %1862 = vmatmul.mubr.bf16.vlgmr.msra.gmra.mrb[20].mxu1 %v1649_v0 }
 0x550   :  { %1187 = vmatpush1.bf16.msra.mxu0 %v2647_v49  ;;  %1866 = vmatpush3.bf16.msra.mxu1 %v2653_v35 }
 0x551   :  { %1188 = vmatprep.subr.bf16.mxu0 %v2659_v22  ;;  %1867 = vmatprep.subr.bf16.mxu1 %v2130_v1 }
 0x552   :  { %1218 = vmatprep.mubr.bf16.mxu0 %v2131_v2  ;;  %1881 = vmatprep.mubr.msk.bf16.mxu1 %vm2132_vm0, %v2130_v1 }
 0x554   :  { %1189 = vmatpush1.bf16.msra.mxu0 %v2669_v29  ;;  %1868 = vmatpush3.bf16.msra.mxu1 %v2675_v58 }
 0x555   :  { %1190 = vmatprep.subr.bf16.mxu0 %v2681_v39  ;;  %1869 = vmatprep.subr.bf16.mxu1 %v2130_v1 }
 0x558   :  { %1191 = vmatpush1.bf16.msra.mxu0 %v2688_v40  ;;  %1870 = vmatpush3.bf16.msra.mxu1 %v2694_v43 }
 0x559   :  { %1192 = vmatprep.subr.bf16.mxu0 %v2700_v45  ;;  %1871 = vmatprep.subr.bf16.mxu1 %v2130_v1 }
 0x55c   :  { %1193 = vmatpush1.bf16.msra.mxu0 %v2707_v46  ;;  %1872 = vmatpush3.bf16.msra.mxu1 %v2825_v17 }
 0x55d   :  { %1194 = vmatprep.subr.bf16.mxu0 %v2714_v23  ;;  %1873 = vmatprep.subr.bf16.mxu1 %v2130_v1 }
 0x560   :  { %1195 = vmatpush1.bf16.msra.mxu0 %v2721_v24  ;;  %1874 = vmatpush3.bf16.msra.mxu1 %v2834_v19 }
 0x561   :  { %1196 = vmatprep.subr.bf16.mxu0 %v2728_v18  ;;  %1875 = vmatprep.subr.bf16.mxu1 %v2130_v1 }
 0x564   :  { %1197 = vmatpush1.bf16.msra.mxu0 %v2735_v51  ;;  %1876 = vmatpush3.bf16.msra.mxu1 %v2843_v42 }
 0x565   :  { %1198 = vmatprep.subr.bf16.mxu0 %v2742_v21  ;;  %1877 = vmatprep.subr.bf16.mxu1 %v2130_v1 }
 0x568   :  { %1199 = vmatpush1.bf16.msra.mxu0 %v2749_v33  ;;  %1878 = vmatpush3.bf16.msra.mxu1 %v2852_v10 }
 0x569   :  { %1200 = vmatprep.subr.bf16.mxu0 %v2756_v25  ;;  %1879 = vmatprep.subr.bf16.mxu1 %v2130_v1 }
 0x56c   :  { %1201 = vmatpush1.bf16.msra.mxu0 %v2763_v53  ;;  %1880 = vmatpush3.bf16.msra.mxu1 %v2861_v44 }
 0x56d   :  { %1345 = vmatprep.subr.bf16.mxu0 %v2770_v27  ;;  %1885 = vmatprep.subr.bf16.mxu1 %v2130_v1  ;;  %v1020_v27 = vadd.f32 %v2875_v50, %v1014_v14 }
 0x622   :  { %v1061_v20 = vpop.f32.mrb[20].mxu0  ;;  %v1104_v30 = vpop.f32.mrb[20].mxu1 }
 0x623   :  { %v1062_v56 = vadd.f32 %v1061_v20, %v2386_v38  ;;  %v1063_v57 = vpop.f32.mrb[21].mxu0  ;;  %v1863_v28 = vpop.f32.mrb[21].mxu1  ;;  %v1016_v20 = vunpack.c.l.bf16 %v1575_v16 }
 0x624   :  { %v1064_v61 = vadd.f32 %v1063_v57, %v2388_v41  ;;  %v1065_v62 = vpop.f32.mrb[22].mxu0  ;;  %v1107_v63 = vpop.f32.mrb[22].mxu1  ;;  %v1019_v57 = vunpack.c.h.bf16 %v1575_v16  ;;  %v2906_v28 = vld [vmem:[%s3032_s1 + $0x10] sm:$0xff] }
 0x625   :  { %v1111_v26 = vadd.f32 %v1062_v56, %v1020_v27  ;;  %v1066_v34 = vadd.f32 %v1065_v62, %v2386_v38  ;;  %v1067_v36 = vpop.f32.mrb[23].mxu0  ;;  %v1864_v4 = vpop.f32.mrb[23].mxu1 }
 0x626   :  { %v1068_v6 = vadd.f32 %v1067_v36, %v2388_v41  ;;  %v1125_v7 = vadd.f32 %v1064_v61, %v1021_v31  ;;  %v1105_v31 = vadd.f32 %v1104_v30, %v2416_v47  ;;  %v1108_v4 = vadd.f32 %v1107_v63, %v2416_v47 }
 0x627   :  { %v1578_v48 = vmul.f32 -1.442695, %v1111_v26  ;;  %v1112_v37 = vadd.f32 %v1066_v34, %v1023_v32  ;;  %v1022_v32 = vadd.f32 %v2906_v28, %v1016_v20  ;;  %v2913_v34 = vld [vmem:[%s3032_s1 + $0x28] sm:$0xff] }
 0x628   :  { %v1126_v9 = vadd.f32 %v1068_v6, %v1024_v52  ;;  %v1580_v55 = vmul.f32 -1.442695, %v1125_v7  ;;  %v1025_v36 = vadd.f32 %v2913_v34, %v1019_v57 }
 0x629   :  { %2040 = vpow2.f32 %v1578_v48  ;;  %v1579_v8 = vmul.f32 -1.442695, %v1112_v37 }
 0x62a   :  { %v1581_v0 = vmul.f32 -1.442695, %v1126_v9 }
 0x62b   :  { %2042 = vpow2.f32 %v1579_v8 }
 0x62c   :  { %2044 = vpow2.f32 %v1580_v55 }
 0x62d   :  { %2046 = vpow2.f32 %v1581_v0 }
 0x633   :  { %v2041_v12 = vpop.eup %2040 }
 0x634   :  { %v1119_v13 = vadd.f32 1.0, %v2041_v12 }
 0x635   :  { %v2043_v14 = vpop.eup %2042 }
 0x636   :  { %2048 = vrcp.f32 %v1119_v13  ;;  %v1120_v15 = vadd.f32 1.0, %v2043_v14  ;;  %v2045_v27 = vpop.eup %2044 }
 0x637   :  { %v2047_v54 = vpop.eup %2046  ;;  %v1133_v56 = vadd.f32 1.0, %v2045_v27 }
 0x638   :  { %2050 = vrcp.f32 %v1120_v15  ;;  %v1134_v61 = vadd.f32 1.0, %v2047_v54 }
 0x639   :  { %2052 = vrcp.f32 %v1133_v56 }
 0x63a   :  { %2054 = vrcp.f32 %v1134_v61 }
 0x640   :  { %v2049_v62 = vpop.eup %2048 }
 0x641   :  { %v1139_v26 = vmul.f32 %v2049_v62, %v1105_v31  ;;  %v1587_v62 = vld [vmem:[%s3030_s0 + $0x98] ss:$12 sps:$4 sm:$0xff]  }
 0x642   :  { %v2051_v52 = vpop.eup %2050 }
 0x643   :  { %v1141_v6 = vadd.f32 %v1139_v26, %v1022_v32  ;;  %v1140_v48 = vmul.f32 %v2051_v52, %v1108_v4  ;;  %v2053_v30 = vpop.eup %2052 }
 0x644   :  { %v2055_v7 = vpop.eup %2054  ;;  %v1145_v8 = vsub.f32 1.0, %v2053_v30  ;;  %v1149_v12 = vmul.f32 %v2053_v30, %v2797_v3 }
 0x645   :  { %2056 = vtanh.f32 %v1141_v6  ;;  %v1142_v37 = vadd.f32 %v1140_v48, %v1025_v36  ;;  %v1146_v55 = vsub.f32 1.0, %v2055_v7  ;;  %v1150_v15 = vmul.f32 %v2055_v7, %v2799_v11 }
 0x646   :  { %v1175_v36 = vunpack.c.l.bf16 %v1587_v62  ;;  %v1178_v6 = vunpack.c.h.bf16 %v1587_v62 }
 0x647   :  { %2058 = vtanh.f32 %v1142_v37 }
 0x648   :  { %v1181_v48 = vadd.f32 %v2906_v28, %v1175_v36 }
 0x64f   :  { %v2057_v9 = vpop.eup %2056 }
 0x650   :  { %v1147_v0 = vmul.f32 %v2057_v9, %v1145_v8  ;;  %v1184_v9 = vadd.f32 %v2913_v34, %v1178_v6  ;;  %v1601_v6 = vld [vmem:[%s3030_s0 + $0xbc] sm:$0xf] }
 0x651   :  { %v2059_v13 = vpop.eup %2058 }
 0x652   :  { %v1148_v14 = vmul.f32 %v2059_v13, %v1146_v55  ;;  %v2919_v63 = vadd.f32 %v1149_v12, %v1147_v0 }
 0x654   :  { %v2921_v16 = vadd.f32 %v1150_v15, %v1148_v14 }
 0x656   :  { %v1654_v27 = vpack.c.bf16 %v2921_v16, %v2919_v63 }
 0x658   :  { %1670 = vst [vmem:[%s3033_s5 + $0x28] sm:$0xff] %v1654_v27   ;;  %1219 = vmatmul.mubr.bf16.vlgmr.msra.gmra.mrb[24].mxu0 %v1654_v27  ;;  %1882 = vmatmul.mubr.bf16.vlgmr.msra.gmra.mrb[24].mxu1 %v1654_v27 }
 0x659   :  { %1346 = vmatpush1.bf16.msra.mxu0 %v2647_v49  ;;  %1886 = vmatpush3.bf16.msra.mxu1 %v2653_v35  ;;  %v1588_v49 = vld [vmem:[%s3030_s0 + $0x9c] sm:$0xff] }
 0x65a   :  { %1347 = vmatprep.subr.bf16.mxu0 %v2659_v22  ;;  %1887 = vmatprep.subr.bf16.mxu1 %v2130_v1  ;;  %v1176_v22 = vunpack.c.l.bf16 %v1588_v49 }
 0x65b   :  { %1377 = vmatprep.mubr.bf16.mxu0 %v2131_v2  ;;  %1901 = vmatprep.mubr.msk.bf16.mxu1 %vm2132_vm0, %v2130_v1  ;;  %v1586_v2 = vld [vmem:[%s3030_s0 + $0x90] sm:$0xff] }
 0x65c   :  { %v1173_v35 = vunpack.c.l.bf16 %v1586_v2 }
 0x65d   :  { %1348 = vmatpush1.bf16.msra.mxu0 %v2669_v29  ;;  %1888 = vmatpush3.bf16.msra.mxu1 %v2675_v58  ;;  %v1174_v29 = vunpack.c.h.bf16 %v1586_v2 }
 0x65e   :  { %1349 = vmatprep.subr.bf16.mxu0 %v2681_v39  ;;  %1889 = vmatprep.subr.bf16.mxu1 %v2130_v1  ;;  %v1179_v58 = vadd.f32 %v2875_v50, %v1173_v35 }
 0x661   :  { %1350 = vmatpush1.bf16.msra.mxu0 %v2688_v40  ;;  %1890 = vmatpush3.bf16.msra.mxu1 %v2694_v43 }
 0x662   :  { %1351 = vmatprep.subr.bf16.mxu0 %v2700_v45  ;;  %1891 = vmatprep.subr.bf16.mxu1 %v2130_v1 }
 0x665   :  { %1352 = vmatpush1.bf16.msra.mxu0 %v2707_v46  ;;  %1892 = vmatpush3.bf16.msra.mxu1 %v2825_v17 }
 0x666   :  { %1353 = vmatprep.subr.bf16.mxu0 %v2714_v23  ;;  %1893 = vmatprep.subr.bf16.mxu1 %v2130_v1  ;;  %v1182_v23 = vadd.f32 %v2882_v59, %v1176_v22 }
 0x669   :  { %1354 = vmatpush1.bf16.msra.mxu0 %v2721_v24  ;;  %1894 = vmatpush3.bf16.msra.mxu1 %v2834_v19  ;;  %v1180_v24 = vadd.f32 %v2888_v60, %v1174_v29 }
 0x66a   :  { %1355 = vmatprep.subr.bf16.mxu0 %v2728_v18  ;;  %1895 = vmatprep.subr.bf16.mxu1 %v2130_v1 }
 0x66d   :  { %1356 = vmatpush1.bf16.msra.mxu0 %v2735_v51  ;;  %1896 = vmatpush3.bf16.msra.mxu1 %v2843_v42 }
 0x66e   :  { %1357 = vmatprep.subr.bf16.mxu0 %v2742_v21  ;;  %1897 = vmatprep.subr.bf16.mxu1 %v2130_v1 }
 0x671   :  { %1358 = vmatpush1.bf16.msra.mxu0 %v2749_v33  ;;  %1898 = vmatpush3.bf16.msra.mxu1 %v2852_v10 }
 0x672   :  { %1359 = vmatprep.subr.bf16.mxu0 %v2756_v25  ;;  %1899 = vmatprep.subr.bf16.mxu1 %v2130_v1  ;;  %v1177_v1 = vunpack.c.h.bf16 %v1588_v49 }
 0x674   :  { %v1183_v11 = vadd.f32 %v2896_v5, %v1177_v1 }
 0x675   :  { %1360 = vmatpush1.bf16.msra.mxu0 %v2763_v53  ;;  %1900 = vmatpush3.bf16.msra.mxu1 %v2861_v44 }
 0x72b   :  { %v1220_v39 = vpop.f32.mrb[24].mxu0  ;;  %v1263_v40 = vpop.f32.mrb[24].mxu1 }
 0x72c   :  { %v1221_v43 = vadd.f32 %v1220_v39, %v2386_v38  ;;  %v1222_v45 = vpop.f32.mrb[25].mxu0  ;;  %v1883_v46 = vpop.f32.mrb[25].mxu1  ;;  %v1264_v37 = vadd.f32 %v1263_v40, %v2416_v47 }
 0x72d   :  { %v1223_v18 = vadd.f32 %v1222_v45, %v2388_v41  ;;  %v1224_v51 = vpop.f32.mrb[26].mxu0  ;;  %v1266_v21 = vpop.f32.mrb[26].mxu1 }
 0x72e   :  { %v1270_v33 = vadd.f32 %v1221_v43, %v1179_v58  ;;  %v1225_v25 = vadd.f32 %v1224_v51, %v2386_v38  ;;  %v1226_v53 = vpop.f32.mrb[27].mxu0  ;;  %v1884_v3 = vpop.f32.mrb[27].mxu1  ;;  %v1267_v55 = vadd.f32 %v1266_v21, %v2416_v47 }
 0x72f   :  { %v1227_v17 = vadd.f32 %v1226_v53, %v2388_v41  ;;  %v1284_v10 = vadd.f32 %v1223_v18, %v1180_v24 }
 0x730   :  { %v1590_v19 = vmul.f32 -1.442695, %v1270_v33  ;;  %v1271_v42 = vadd.f32 %v1225_v25, %v1182_v23 }
 0x731   :  { %v1285_v20 = vadd.f32 %v1227_v17, %v1183_v11  ;;  %v1592_v54 = vmul.f32 -1.442695, %v1284_v10 }
 0x732   :  { %2060 = vpow2.f32 %v1590_v19  ;;  %v1591_v44 = vmul.f32 -1.442695, %v1271_v42 }
 0x733   :  { %v1593_v56 = vmul.f32 -1.442695, %v1285_v20 }
 0x734   :  { %2062 = vpow2.f32 %v1591_v44 }
 0x735   :  { %2064 = vpow2.f32 %v1592_v54 }
 0x736   :  { %2066 = vpow2.f32 %v1593_v56 }
 0x73c   :  { %v2061_v57 = vpop.eup %2060 }
 0x73d   :  { %v1278_v32 = vadd.f32 1.0, %v2061_v57 }
 0x73e   :  { %v2063_v31 = vpop.eup %2062 }
 0x73f   :  { %2068 = vrcp.f32 %v1278_v32  ;;  %v1279_v61 = vadd.f32 1.0, %v2063_v31  ;;  %v2065_v26 = vpop.eup %2064 }
 0x740   :  { %v2067_v4 = vpop.eup %2066  ;;  %v1292_v52 = vadd.f32 1.0, %v2065_v26 }
 0x741   :  { %2070 = vrcp.f32 %v1279_v61  ;;  %v1293_v30 = vadd.f32 1.0, %v2067_v4 }
 0x742   :  { %2072 = vrcp.f32 %v1292_v52 }
 0x743   :  { %2074 = vrcp.f32 %v1293_v30 }
 0x749   :  { %v2069_v7 = vpop.eup %2068 }
 0x74a   :  { %v1298_v8 = vmul.f32 %v2069_v7, %v1264_v37  ;;  %v1337_v7 = vunpack.c.l.bf16 %v1601_v6 }
 0x74b   :  { %v2071_v0 = vpop.eup %2070 }
 0x74c   :  { %v1300_v12 = vadd.f32 %v1298_v8, %v1181_v48  ;;  %v1299_v13 = vmul.f32 %v2071_v0, %v1267_v55  ;;  %v2073_v15 = vpop.eup %2072 }
 0x74d   :  { %v2075_v27 = vpop.eup %2074  ;;  %v1304_v2 = vsub.f32 1.0, %v2073_v15  ;;  %v1308_v29 = vmul.f32 %v2073_v15, %v2919_v63  ;;  %v1598_v63 = vld [vmem:[%s3030_s0 + $0xa8] sm:$0xff] }
 0x74e   :  { %2076 = vtanh.f32 %v1300_v12  ;;  %v1301_v14 = vadd.f32 %v1299_v13, %v1184_v9  ;;  %v1305_v35 = vsub.f32 1.0, %v2075_v27  ;;  %v1309_v40 = vmul.f32 %v2075_v27, %v2921_v16  ;;  %v1600_v16 = vld [vmem:[%s3030_s0 + $0xb4] sm:$0xff] }
 0x74f   :  { %v1332_v46 = vunpack.c.l.bf16 %v1598_v63  ;;  %v1335_v23 = vunpack.c.l.bf16 %v1600_v16  ;;  %v1333_v24 = vunpack.c.h.bf16 %v1598_v63  ;;  %v1336_v33 = vunpack.c.h.bf16 %v1600_v16 }
 0x750   :  { %2078 = vtanh.f32 %v1301_v14  ;;  %v1343_v13 = vadd.f32 %v2913_v34, %v1337_v7 }
 0x751   :  { %v1338_v18 = vadd.f32 %v2875_v50, %v1332_v46  ;;  %v1341_v11 = vadd.f32 %v2882_v59, %v1335_v23  ;;  %v1339_v17 = vadd.f32 %v2888_v60, %v1333_v24  ;;  %v1342_v56 = vadd.f32 %v2896_v5, %v1336_v33 }
 0x758   :  { %v2077_v49 = vpop.eup %2076 }
 0x759   :  { %v1306_v22 = vmul.f32 %v2077_v49, %v1304_v2 }
 0x75a   :  { %v2079_v58 = vpop.eup %2078 }
 0x75b   :  { %v1307_v39 = vmul.f32 %v2079_v58, %v1305_v35  ;;  %v2984_v1 = vadd.f32 %v1308_v29, %v1306_v22 }
 0x75d   :  { %v2986_v43 = vadd.f32 %v1309_v40, %v1307_v39 }
 0x75f   :  { %v1659_v45 = vpack.c.bf16 %v2986_v43, %v2984_v1 }
 0x761   :  { %1671 = vst [vmem:[%s3033_s5 + $0x30] sm:$0xff] %v1659_v45   ;;  %1378 = vmatmul.mubr.bf16.vlgmr.msra.gmra.mrb[28].mxu0 %v1659_v45  ;;  %1902 = vmatmul.mubr.bf16.vlgmr.msra.gmra.mrb[28].mxu1 %v1659_v45 }
 0x834   :  { %v1379_v51 = vpop.f32.mrb[28].mxu0  ;;  %v1422_v21 = vpop.f32.mrb[28].mxu1 }
 0x835   :  { %v1380_v25 = vadd.f32 %v1379_v51, %v2386_v38  ;;  %v1381_v53 = vpop.f32.mrb[29].mxu0  ;;  %v1903_v3 = vpop.f32.mrb[29].mxu1  ;;  %v1423_v9 = vadd.f32 %v1422_v21, %v2416_v47 }
 0x836   :  { %v1382_v19 = vadd.f32 %v1381_v53, %v2388_v41  ;;  %v1383_v42 = vpop.f32.mrb[30].mxu0  ;;  %v1425_v10 = vpop.f32.mrb[30].mxu1 }
 0x837   :  { %v1429_v44 = vadd.f32 %v1380_v25, %v1338_v18  ;;  %v1384_v20 = vadd.f32 %v1383_v42, %v2386_v38  ;;  %v1385_v54 = vpop.f32.mrb[31].mxu0  ;;  %v1904_v50 = vpop.f32.mrb[31].mxu1  ;;  %v1426_v14 = vadd.f32 %v1425_v10, %v2416_v47 }
 0x838   :  { %v1386_v57 = vadd.f32 %v1385_v54, %v2388_v41  ;;  %v1443_v61 = vadd.f32 %v1382_v19, %v1339_v17  ;;  %v1599_v41 = vld [vmem:[%s3030_s0 + $0xb0] sm:$0xf] }
 0x839   :  { %v1602_v32 = vmul.f32 -1.442695, %v1429_v44  ;;  %v1430_v31 = vadd.f32 %v1384_v20, %v1341_v11  ;;  %v1334_v48 = vunpack.c.l.bf16 %v1599_v41 }
 0x83a   :  { %v1444_v62 = vadd.f32 %v1386_v57, %v1342_v56  ;;  %v1604_v60 = vmul.f32 -1.442695, %v1443_v61 }
 0x83b   :  { %2080 = vpow2.f32 %v1602_v32  ;;  %v1603_v59 = vmul.f32 -1.442695, %v1430_v31  ;;  %v1340_v8 = vadd.f32 %v2906_v28, %v1334_v48 }
 0x83c   :  { %v1605_v26 = vmul.f32 -1.442695, %v1444_v62 }
 0x83d   :  { %2082 = vpow2.f32 %v1603_v59 }
 0x83e   :  { %2084 = vpow2.f32 %v1604_v60 }
 0x83f   :  { %2086 = vpow2.f32 %v1605_v26 }
 0x845   :  { %v2081_v36 = vpop.eup %2080 }
 0x846   :  { %v1437_v4 = vadd.f32 1.0, %v2081_v36 }
 0x847   :  { %v2083_v38 = vpop.eup %2082 }
 0x848   :  { %2088 = vrcp.f32 %v1437_v4  ;;  %v1438_v52 = vadd.f32 1.0, %v2083_v38  ;;  %v2085_v5 = vpop.eup %2084 }
 0x849   :  { %v2087_v37 = vpop.eup %2086  ;;  %v1451_v30 = vadd.f32 1.0, %v2085_v5 }
 0x84a   :  { %2090 = vrcp.f32 %v1438_v52  ;;  %v1452_v55 = vadd.f32 1.0, %v2087_v37 }
 0x84b   :  { %2092 = vrcp.f32 %v1451_v30 }
 0x84c   :  { %2094 = vrcp.f32 %v1452_v55 }
 0x852   :  { %v2089_v0 = vpop.eup %2088 }
 0x853   :  { %v1457_v12 = vmul.f32 %v2089_v0, %v1423_v9 }
 0x854   :  { %v2091_v15 = vpop.eup %2090 }
 0x855   :  { %v1459_v27 = vadd.f32 %v1457_v12, %v1340_v8  ;;  %v1458_v2 = vmul.f32 %v2091_v15, %v1426_v14  ;;  %v2093_v35 = vpop.eup %2092 }
 0x856   :  { %v2095_v22 = vpop.eup %2094  ;;  %v1463_v28 = vsub.f32 1.0, %v2093_v35  ;;  %v1467_v39 = vmul.f32 %v2093_v35, %v2984_v1 }
 0x857   :  { %2096 = vtanh.f32 %v1459_v27  ;;  %v1460_v49 = vadd.f32 %v1458_v2, %v1343_v13  ;;  %v1464_v40 = vsub.f32 1.0, %v2095_v22  ;;  %v1468_v47 = vmul.f32 %v2095_v22, %v2986_v43 }
 0x859   :  { %2098 = vtanh.f32 %v1460_v49 }
 0x861   :  { %v2097_v29 = vpop.eup %2096 }
 0x862   :  { %v1465_v58 = vmul.f32 %v2097_v29, %v1463_v28 }
 0x863   :  { %v2099_v45 = vpop.eup %2098 }
 0x864   :  { %v1469_v63 = vadd.f32 %v1467_v39, %v1465_v58  ;;  %v1466_v34 = vmul.f32 %v2099_v45, %v1464_v40 }
 0x866   :  { %1486 = vst [vmem:[%s3034_s6] sm:$0xff] %v1469_v63  ;;  %v1470_v16 = vadd.f32 %v1468_v47, %v1466_v34 }
 0x868   :  { %v1664_v46 = vpack.c.bf16 %v1470_v16, %v1469_v63  ;;  %1487 = vst [vmem:[%s3034_s6 + $0x8] sm:$0xff] %v1470_v16 }
 0x86a   :  { %1672 = vst [vmem:[%s3033_s5 + $0x38] sm:$0xff] %v1664_v46  }

</bundles_post_ra>
